<compile_context>
chip_gen: v6e
topology: v6e:2x2x1
jax: 0.10.0
libtpu: 0.0.40
codegen_flags: <defaults>
</compile_context>

<pallas_src>
import functools

import jax
import jax.numpy as jnp
from jax.experimental import pallas as pl
from jax.experimental.pallas import tpu as pltpu


def _round_up(x, m):
    return ((x + m - 1) // m) * m


def _cdiv(a, b):
    return (a + b - 1) // b


def _vmem_capacity_bytes():
    """Per-TensorCore VMEM capacity; conservative fallback if query fails."""
    try:
        cap = int(pltpu.get_tpu_info().vmem_capacity_bytes)
        if cap > 0:
            return cap
    except Exception:
        pass
    return 64 << 20  # conservative: v7x per-TC VMEM


# ----------------------------------------------------------------------------
# Pallas kernels: fused Projector MLP  (Linear -> ReLU -> Linear)
#   out = relu(x @ W1 + b1) @ W2 + b2
# ----------------------------------------------------------------------------
def projector_kernel_single(x_ref, w1_ref, b1_ref, w2_ref, b2_ref, o_ref):
    """Weights fully resident in VMEM; one reduction step; no f32 acc scratch."""
    hidden = jnp.dot(x_ref[...], w1_ref[...],
                     preferred_element_type=jnp.float32) + b1_ref[...]
    hidden = jnp.maximum(hidden, 0.0)
    out = jnp.dot(hidden.astype(w2_ref.dtype), w2_ref[...],
                  preferred_element_type=jnp.float32) + b2_ref[...]
    o_ref[...] = out.astype(o_ref.dtype)


def projector_kernel_multi(x_ref, w1_ref, b1_ref, w2_ref, b2_ref, o_ref, acc_ref):
    """Fallback: H (intermediate dim) chunked reduction with an f32 accumulator.

    Per-chunk ReLU is correct ONLY because the reduction splits H (each hidden
    chunk is fully contracted over D_in before ReLU), never D_in.
    """
    h = pl.program_id(1)

    @pl.when(h == 0)
    def _():
        # Fold the output bias into the accumulator init (no epilogue add).
        acc_ref[...] = jnp.broadcast_to(b2_ref[...], acc_ref.shape)

    hidden = jnp.dot(x_ref[...], w1_ref[...],
                     preferred_element_type=jnp.float32) + b1_ref[...]
    hidden = jnp.maximum(hidden, 0.0)
    acc_ref[...] += jnp.dot(hidden.astype(w2_ref.dtype), w2_ref[...],
                            preferred_element_type=jnp.float32)

    @pl.when(h == pl.num_programs(1) - 1)
    def _():
        o_ref[...] = acc_ref[...].astype(o_ref.dtype)


def projector_pallas(x, w1, b1, w2, b2, *, tile_m=None, tile_h=512,
                     out_dtype=jnp.bfloat16, vmem_limit_bytes=None,
                     force_multi_step=False):
    """x: (M, D_in) -> (M, D_out) out_dtype, fused MLP on TPU.

    Streams x in bf16, keeps bf16 weights VMEM-resident when they fit the
    per-generation budget (single HBM read), accumulates in f32 on the MXU,
    and emits a lane-dense (D_out padded to 128) output.
    """
    M, D_in = x.shape
    H = w1.shape[1]
    D_out = w2.shape[1]
    D_out_p = _round_up(D_out, 128)   # lane-dense output tile

    # ---- per-generation VMEM budget / defaults ------------------------------
    vmem_cap = _vmem_capacity_bytes()
    if vmem_cap >= (100 << 20):          # v5e / v6e class: 128 MiB per TC
        default_tile_m = 512
        budget = 96 << 20
    else:                                 # v7x class (64 MiB per TC) or older
        default_tile_m = 256
        budget = max(min(56 << 20, vmem_cap - (8 << 20)), 8 << 20)
    if vmem_limit_bytes is None:
        vmem_limit_bytes = budget
    budget = min(budget, vmem_limit_bytes)
    slack = 2 << 20

    # ---- row (M) tiling ------------------------------------------------------
    tile_m = default_tile_m if tile_m is None else tile_m
    tile_m = max(8, min(_round_up(tile_m, 8), _round_up(M, 8)))
    if M > 8 and _cdiv(M, tile_m) == 1:
        # >= 2 tiles on the "parallel" axis so both v7x TensorCores get work.
        tile_m = max(8, _round_up(_cdiv(M, 2), 8))

    def single_step_bytes(tm):
        return (2 * tm * D_in * 2                  # x, double-buffered bf16
                + D_in * H * 2 + H * 4             # W1 + b1 resident (1 copy)
                + H * D_out_p * 2 + D_out_p * 4    # W2 + b2 resident (1 copy)
                + 2 * tm * D_out_p * 2             # out, double-buffered bf16
                + tm * H * 6 + tm * D_out_p * 4)   # in-kernel f32/bf16 temps

    def multi_step_bytes(tm, th):
        return (2 * tm * D_in * 2
                + 2 * D_in * th * 2 + 2 * th * 4       # W1 / b1 chunks, dbuf
                + 2 * th * D_out_p * 2 + D_out_p * 4   # W2 chunks dbuf, b2 1 copy
                + 2 * tm * D_out_p * 2
                + tm * D_out_p * 4                     # f32 accumulator
                + tm * th * 6 + tm * D_out_p * 4)      # in-kernel temps

    # Prefer the weights-resident single-step layout; shrink tile_m (>=128)
    # before giving it up.
    single_step = (not force_multi_step) and \
        single_step_bytes(tile_m) + slack <= budget
    while (not force_multi_step) and (not single_step) and tile_m > 128:
        tile_m = max(128, tile_m // 2)
        single_step = single_step_bytes(tile_m) + slack <= budget

    if not single_step:
        tile_h = min(tile_h, H)
        if H % tile_h != 0:
            raise ValueError("intermediate dim must be divisible by tile_h")
        while (multi_step_bytes(tile_m, tile_h) + slack > budget
               and tile_h > 128 and tile_h % 2 == 0
               and H % (tile_h // 2) == 0):
            tile_h //= 2

    num_m = _cdiv(M, tile_m)

    # ---- operands (bf16 streaming, f32 biases) -------------------------------
    # Callers can pre-cast params/x to bf16 to avoid per-call casts in HBM.
    xb = x if x.dtype == jnp.bfloat16 else x.astype(jnp.bfloat16)
    w1b = w1.astype(jnp.bfloat16)
    w2b = w2.astype(jnp.bfloat16)
    b1_2d = b1.astype(jnp.float32).reshape(1, H)
    b2p = b2.astype(jnp.float32)
    if D_out_p != D_out:
        w2b = jnp.pad(w2b, ((0, 0), (0, D_out_p - D_out)))
        b2p = jnp.pad(b2p, (0, D_out_p - D_out))
    b2_2d = b2p.reshape(1, D_out_p)

    cost = pl.CostEstimate(
        flops=2 * M * (D_in * H + H * D_out_p),
        transcendentals=0,
        bytes_accessed=(M * D_in * 2 + D_in * H * 2 + H * 4
                        + H * D_out_p * 2 + D_out_p * 4 + M * D_out_p * 2),
    )

    if single_step:
        # Whole-array VMEM residency: one HBM->VMEM copy, no second buffer.
        resident = pl.BlockSpec(memory_space=pltpu.MemorySpace.VMEM)
        out = pl.pallas_call(
            projector_kernel_single,
            out_shape=jax.ShapeDtypeStruct((M, D_out_p), out_dtype),
            grid_spec=pltpu.PrefetchScalarGridSpec(
                num_scalar_prefetch=0,
                grid=(num_m,),
                in_specs=[
                    pl.BlockSpec((tile_m, D_in), lambda m: (m, 0)),   # x rows
                    resident,                                         # W1
                    resident,                                         # b1
                    resident,                                         # W2
                    resident,                                         # b2
                ],
                out_specs=pl.BlockSpec((tile_m, D_out_p), lambda m: (m, 0)),
            ),
            compiler_params=pltpu.CompilerParams(
                dimension_semantics=("parallel",),
                vmem_limit_bytes=vmem_limit_bytes,
            ),
            cost_estimate=cost,
        )(xb, w1b, b1_2d, w2b, b2_2d)
    else:
        n_h = H // tile_h
        # Contiguous per-chunk W1 layout: (n_h, D_in, tile_h) so each chunk DMA
        # is a contiguous copy rather than a D_in-row strided one.
        w1c = w1b.reshape(D_in, n_h, tile_h).transpose(1, 0, 2)
        out = pl.pallas_call(
            projector_kernel_multi,
            out_shape=jax.ShapeDtypeStruct((M, D_out_p), out_dtype),
            grid_spec=pltpu.PrefetchScalarGridSpec(
                num_scalar_prefetch=0,
                grid=(num_m, n_h),
                in_specs=[
                    pl.BlockSpec((tile_m, D_in), lambda m, h: (m, 0)),     # x
                    pl.BlockSpec((None, D_in, tile_h),
                                 lambda m, h: (h, 0, 0)),                  # W1 chunk
                    pl.BlockSpec((1, tile_h), lambda m, h: (0, h)),        # b1 chunk
                    pl.BlockSpec((tile_h, D_out_p), lambda m, h: (h, 0)),  # W2 chunk
                    pl.BlockSpec(memory_space=pltpu.MemorySpace.VMEM),     # b2 (1 copy)
                ],
                out_specs=pl.BlockSpec((tile_m, D_out_p), lambda m, h: (m, 0)),
                scratch_shapes=[pltpu.VMEM((tile_m, D_out_p), jnp.float32)],
            ),
            compiler_params=pltpu.CompilerParams(
                dimension_semantics=("parallel", "arbitrary"),
                vmem_limit_bytes=vmem_limit_bytes,
            ),
            cost_estimate=cost,
        )(xb, w1c, b1_2d, w2b, b2_2d)

    # Strip lane padding (edge-block junk rows are never written: partial
    # output blocks are clipped to the (M, D_out_p) out_shape). Keep the slice.
    if D_out_p != D_out:
        out = out[:, :D_out]
    return out


# ----------------------------------------------------------------------------
# SLAM_ASR forward-pass glue (downsample / projector / prompt concat).
# ----------------------------------------------------------------------------
def downsample(features, k):
    """Fold k consecutive timesteps into the hidden dim (pure reshape)."""
    b, s, h = features.shape
    if s % k != 0:
        raise ValueError("Sequence length must be divisible by the downsample factor")
    return features.reshape(b, s // k, k * h)


@functools.partial(jax.jit, static_argnames=("k",))
def slam_asr_forward(encoded_features, params, user_prompt_embeds,
                     assistant_prompt_embeds, k=5):
    """
    encoded_features: (B, S, speech_hidden) f32 -- stand-in for
        WhisperModel.encoder(...).last_hidden_state.
    Returns inputs_embeds: (B, U + S//k + A, llm_hidden) bf16, i.e. the tensor
    fed to llm_model.generate(inputs_embeds=...).
    """
    # TODO(synk): the Whisper speech encoder and the LLM beam-search generate()
    # are full pretrained models with no clean single-kernel Pallas equivalent;
    # this implements the downsample + Projector hot path and the embed concat.
    B, S, Hs = encoded_features.shape
    # Cast to bf16 before the (free) downsample reshape so the kernel wrapper
    # needs no extra cast/pad pass over x in HBM.
    ds = downsample(encoded_features.astype(jnp.bfloat16), k)   # (B, S//k, k*Hs)
    M = B * (S // k)
    x2d = ds.reshape(M, k * Hs)

    proj = projector_pallas(x2d, params["w1"], params["b1"],
                            params["w2"], params["b2"])  # (M, llm_hidden) bf16
    proj = proj.reshape(B, S // k, -1)

    user = jnp.broadcast_to(
        user_prompt_embeds.astype(jnp.bfloat16),
        (B,) + user_prompt_embeds.shape[1:])
    asst = jnp.broadcast_to(
        assistant_prompt_embeds.astype(jnp.bfloat16),
        (B,) + assistant_prompt_embeds.shape[1:])

    inputs_embeds = jnp.concatenate([user, proj, asst], axis=1)
    return inputs_embeds


if __name__ == "__main__":
    # Small shapes consistent with the module:
    #   downsample factor k=5, seq divisible by 5, projector intermediate = 2048.
    B = 2
    S = 20                 # speech-encoder sequence length
    SPEECH_HIDDEN = 32     # stand-in for whisper encoder hidden size
    LLM_HIDDEN = 64        # stand-in for Qwen hidden size
    K = 5
    D_IN = SPEECH_HIDDEN * K
    PROJ_HIDDEN = 2048
    U_LEN, A_LEN = 3, 6    # synthetic prompt lengths

    key = jax.random.PRNGKey(0)
    ks = jax.random.split(key, 8)

    # Synthetic "last_hidden_state" from the (frozen) speech encoder.
    encoded_features = jax.random.normal(ks[0], (B, S, SPEECH_HIDDEN), jnp.float32)

    # Projector parameters (Linear(D_IN,2048) -> ReLU -> Linear(2048,LLM_HIDDEN)).
    params = {
        "w1": jax.random.normal(ks[1], (D_IN, PROJ_HIDDEN), jnp.float32) * 0.02,
        "b1": jax.random.normal(ks[2], (PROJ_HIDDEN,), jnp.float32) * 0.01,
        "w2": jax.random.normal(ks[3], (PROJ_HIDDEN, LLM_HIDDEN), jnp.float32) * 0.02,
        "b2": jax.random.normal(ks[4], (LLM_HIDDEN,), jnp.float32) * 0.01,
    }

    # Synthetic static prompt embeddings (stand-ins for init_prompts()).
    user_prompt_embeds = jax.random.normal(ks[5], (1, U_LEN, LLM_HIDDEN), jnp.float32)
    assistant_prompt_embeds = jax.random.normal(ks[6], (1, A_LEN, LLM_HIDDEN), jnp.float32)

    out = slam_asr_forward(encoded_features, params, user_prompt_embeds,
                           assistant_prompt_embeds, k=K)
    out = jax.block_until_ready(out)

    # --- Correctness: full forward glue against pure-JAX f32 reference -------
    ds = downsample(encoded_features, K).reshape(B * (S // K), D_IN)
    ref = jnp.maximum(ds @ params["w1"] + params["b1"], 0.0) @ params["w2"] + params["b2"]
    ref = ref.astype(jnp.bfloat16).reshape(B, S // K, LLM_HIDDEN)
    ref_full = jnp.concatenate(
        [jnp.broadcast_to(user_prompt_embeds.astype(jnp.bfloat16), (B, U_LEN, LLM_HIDDEN)),
         ref,
         jnp.broadcast_to(assistant_prompt_embeds.astype(jnp.bfloat16), (B, A_LEN, LLM_HIDDEN))],
        axis=1)
    assert out.shape == (B, U_LEN + S // K + A_LEN, LLM_HIDDEN)
    assert out.dtype == jnp.bfloat16
    assert jnp.allclose(out.astype(jnp.float32), ref_full.astype(jnp.float32),
                        atol=2e-2, rtol=2e-2)

    # --- Correctness: ragged M (not a multiple of 8) + >=2 parallel M tiles --
    M2 = 21
    x2 = jax.random.normal(ks[7], (M2, D_IN), jnp.float32)
    ref2 = jnp.maximum(x2 @ params["w1"] + params["b1"], 0.0) @ params["w2"] + params["b2"]

    got2 = projector_pallas(x2, params["w1"], params["b1"],
                            params["w2"], params["b2"])
    got2 = jax.block_until_ready(got2)
    assert got2.shape == (M2, LLM_HIDDEN)
    assert jnp.allclose(got2.astype(jnp.float32), ref2, atol=2e-2, rtol=2e-2)

    # --- Correctness: exercise the H-chunked multi-step fallback path --------
    got3 = projector_pallas(x2, params["w1"], params["b1"],
                            params["w2"], params["b2"],
                            force_multi_step=True, tile_h=512)
    got3 = jax.block_until_ready(got3)
    assert got3.shape == (M2, LLM_HIDDEN)
    assert jnp.allclose(got3.astype(jnp.float32), ref2, atol=2e-2, rtol=2e-2)

    print("KERNEL_OK")
</pallas_src>

<mosaic_0001>
module attributes {stable_mosaic.version = 11 : i64} {
  func.func @projector_kernel_single(%arg0: i32, %arg1: memref<8x160xbf16, #tpu.memory_space<vmem>>, %arg2: memref<160x2048xbf16, #tpu.memory_space<vmem>>, %arg3: memref<1x2048xf32, #tpu.memory_space<vmem>>, %arg4: memref<2048x128xbf16, #tpu.memory_space<vmem>>, %arg5: memref<1x128xf32, #tpu.memory_space<vmem>>, %arg6: memref<8x128xbf16, #tpu.memory_space<vmem>>) attributes {dimension_semantics = [#tpu.dimension_semantics<parallel>], iteration_bounds = array<i64: 1>, scalar_prefetch = 0 : i64, scratch_operands = 0 : i64, tpu.core_type = #tpu.core_type<tc>, window_params = [{transform_indices = @transform_0, window_bounds = array<i64: 8, 160>}, {pipeline_mode = #tpu.pipeline_mode<synchronous>, transform_indices = @transform_1, window_bounds = array<i64: 160, 2048>}, {pipeline_mode = #tpu.pipeline_mode<synchronous>, transform_indices = @transform_2, window_bounds = array<i64: 1, 2048>}, {pipeline_mode = #tpu.pipeline_mode<synchronous>, transform_indices = @transform_3, window_bounds = array<i64: 2048, 128>}, {pipeline_mode = #tpu.pipeline_mode<synchronous>, transform_indices = @transform_4, window_bounds = array<i64: 1, 128>}, {transform_indices = @transform_5, window_bounds = array<i64: 8, 128>}]} {
    %c0 = arith.constant 0 : index
    %c0_0 = arith.constant 0 : index
    %0 = vector.load %arg1[%c0, %c0_0] : memref<8x160xbf16, #tpu.memory_space<vmem>>, vector<8x160xbf16>
    %c0_1 = arith.constant 0 : index
    %c0_2 = arith.constant 0 : index
    %1 = vector.load %arg2[%c0_1, %c0_2] : memref<160x2048xbf16, #tpu.memory_space<vmem>>, vector<160x2048xbf16>
    %cst = arith.constant dense<0.000000e+00> : vector<8x2048xf32>
    %2 = tpu.matmul %0, %1, %cst {dimension_numbers = #tpu.dot_dimension_numbers<[1], [0], [0], [1], [0, 0, 1, 1], [], []>} : vector<8x160xbf16>, vector<160x2048xbf16>, vector<8x2048xf32> -> vector<8x2048xf32>
    %c0_3 = arith.constant 0 : index
    %c0_4 = arith.constant 0 : index
    %3 = vector.load %arg3[%c0_3, %c0_4] : memref<1x2048xf32, #tpu.memory_space<vmem>>, vector<1x2048xf32>
    %4 = vector.broadcast %3 : vector<1x2048xf32> to vector<8x2048xf32>
    %5 = arith.addf %2, %4 : vector<8x2048xf32>
    %cst_5 = arith.constant 0.000000e+00 : f32
    %6 = vector.broadcast %cst_5 : f32 to vector<8x2048xf32>
    %7 = arith.maximumf %5, %6 : vector<8x2048xf32>
    %8 = arith.truncf %7 : vector<8x2048xf32> to vector<8x2048xbf16>
    %c0_6 = arith.constant 0 : index
    %c0_7 = arith.constant 0 : index
    %9 = vector.load %arg4[%c0_6, %c0_7] : memref<2048x128xbf16, #tpu.memory_space<vmem>>, vector<2048x128xbf16>
    %cst_8 = arith.constant dense<0.000000e+00> : vector<8x128xf32>
    %10 = tpu.matmul %8, %9, %cst_8 {dimension_numbers = #tpu.dot_dimension_numbers<[1], [0], [0], [1], [0, 0, 1, 1], [], []>} : vector<8x2048xbf16>, vector<2048x128xbf16>, vector<8x128xf32> -> vector<8x128xf32>
    %c0_9 = arith.constant 0 : index
    %c0_10 = arith.constant 0 : index
    %11 = vector.load %arg5[%c0_9, %c0_10] : memref<1x128xf32, #tpu.memory_space<vmem>>, vector<1x128xf32>
    %12 = vector.broadcast %11 : vector<1x128xf32> to vector<8x128xf32>
    %13 = arith.addf %10, %12 : vector<8x128xf32>
    %14 = arith.truncf %13 : vector<8x128xf32> to vector<8x128xbf16>
    %c0_11 = arith.constant 0 : index
    %c0_12 = arith.constant 0 : index
    %15 = vector.load %arg6[%c0_11, %c0_12] : memref<8x128xbf16, #tpu.memory_space<vmem>>, vector<8x128xbf16>
    tpu.vector_store %arg6[%c0_11, %c0_12], %14 {strides = array<i32>} : memref<8x128xbf16, #tpu.memory_space<vmem>>, vector<8x128xbf16>,
    return
  }
  func.func @transform_0(%arg0: i32) -> (i32, i32) {
    %c0_i32 = arith.constant 0 : i32
    %c0_i32_0 = arith.constant 0 : i32
    return %arg0, %c0_i32 : i32, i32
  }
  func.func @transform_1(%arg0: i32) -> (i32, i32) {
    %c0_i32 = arith.constant 0 : i32
    %c0_i32_0 = arith.constant 0 : i32
    %c0_i32_1 = arith.constant 0 : i32
    return %c0_i32, %c0_i32_0 : i32, i32
  }
  func.func @transform_2(%arg0: i32) -> (i32, i32) {
    %c0_i32 = arith.constant 0 : i32
    %c0_i32_0 = arith.constant 0 : i32
    %c0_i32_1 = arith.constant 0 : i32
    return %c0_i32, %c0_i32_0 : i32, i32
  }
  func.func @transform_3(%arg0: i32) -> (i32, i32) {
    %c0_i32 = arith.constant 0 : i32
    %c0_i32_0 = arith.constant 0 : i32
    %c0_i32_1 = arith.constant 0 : i32
    return %c0_i32, %c0_i32_0 : i32, i32
  }
  func.func @transform_4(%arg0: i32) -> (i32, i32) {
    %c0_i32 = arith.constant 0 : i32
    %c0_i32_0 = arith.constant 0 : i32
    %c0_i32_1 = arith.constant 0 : i32
    return %c0_i32, %c0_i32_0 : i32, i32
  }
  func.func @transform_5(%arg0: i32) -> (i32, i32) {
    %c0_i32 = arith.constant 0 : i32
    %c0_i32_0 = arith.constant 0 : i32
    return %arg0, %c0_i32 : i32, i32
  }
}

</mosaic_0001>

<bundles_post_ra>
// kernel: slam_asr_forward.1
= control target key start
LH: loop header
LB: loop body
LE: loop exit
PB: predicated region body
PF: predicated region fallthrough
CT: control target
= control target key end

     0   :  { %vm1072_vm0 = vcmask 261120   ;;  %s4403_s1 = inlined_call_operand.vmem [shape: bf16[160,2048], index: 1, kind: input, shape index: {}]   ;;  %s4404_s0 = inlined_call_operand.vmem [shape: bf16[8,160], index: 0, kind: input, shape index: {}]   ;;  %s4405_s3 = inlined_call_operand.vmem [shape: bf16[2048,128], index: 3, kind: input, shape index: {}]   ;;  %s4406_s2 = inlined_call_operand.vmem [shape: f32[1,2048], index: 2, kind: input, shape index: {}]   ;;  %s4407_s4 = inlined_call_operand.vmem [shape: f32[1,128], index: 4, kind: input, shape index: {}]   ;;  %s4408_s5 = inlined_call_operand.vmem [shape: bf16[8,128], index: 5, kind: output, shape index: {}]  }
   0x1   :  { %v134_v0 = vld [vmem:[%s4403_s1 + $0x380] sm:$0xff]  ;;  %v135_v2 = vld [vmem:[%s4403_s1 + $0x388] sm:$0xff] }
   0x2   :  { %v142_v1 = vld [vmem:[%s4403_s1 + $0x3c0] sm:$0xff]  ;;  %v143_v4 = vld [vmem:[%s4403_s1 + $0x3c8] sm:$0xff] }
   0x3   :  { %v2908_v3 = vcombine.high %v134_v0, %v142_v1  ;;  %v2907_v5 = vcombine.low %v134_v0, %v142_v1  ;;  %v118_v6 = vld [vmem:[%s4403_s1 + $0x300] sm:$0xff]  ;;  %v2910_v8 = vcombine.high %v135_v2, %v143_v4  ;;  %v2909_v9 = vcombine.low %v135_v2, %v143_v4  ;;  %v119_v11 = vld [vmem:[%s4403_s1 + $0x308] sm:$0xff] }
   0x4   :  { %v126_v7 = vld [vmem:[%s4403_s1 + $0x340] sm:$0xff]  ;;  %v127_v12 = vld [vmem:[%s4403_s1 + $0x348] sm:$0xff] }
   0x5   :  { %v2892_v10 = vcombine.high %v118_v6, %v126_v7  ;;  %v102_v13 = vld [vmem:[%s4403_s1 + $0x280] sm:$0xff]  ;;  %1076 = vmatprep.subr.bf16.mxu0 %v2908_v3  ;;  %v2894_v14 = vcombine.high %v119_v11, %v127_v12  ;;  %v103_v16 = vld [vmem:[%s4403_s1 + $0x288] sm:$0xff]  ;;  %1117 = vmatprep.subr.bf16.mxu1 %v2910_v8  ;;  %v2891_v18 = vcombine.low %v118_v6, %v126_v7 }
   0x6   :  { %v110_v15 = vld [vmem:[%s4403_s1 + $0x2c0] sm:$0xff]  ;;  %v111_v17 = vld [vmem:[%s4403_s1 + $0x2c8] sm:$0xff]  ;;  %1077 = vmatpush1.bf16.msra.mxu0 %v2907_v5  ;;  %1118 = vmatpush1.bf16.msra.mxu1 %v2909_v9  ;;  %v2893_v19 = vcombine.low %v119_v11, %v127_v12 }
   0x7   :  { %1078 = vmatprep.subr.bf16.mxu0 %v2892_v10  ;;  %v2876_v20 = vcombine.high %v102_v13, %v110_v15  ;;  %1119 = vmatprep.subr.bf16.mxu1 %v2894_v14  ;;  %v2878_v21 = vcombine.high %v103_v16, %v111_v17  ;;  %v86_v22 = vld [vmem:[%s4403_s1 + $0x200] sm:$0xff]  ;;  %v87_v24 = vld [vmem:[%s4403_s1 + $0x208] sm:$0xff]  ;;  %v2875_v26 = vcombine.low %v102_v13, %v110_v15 }
   0x8   :  { %v94_v23 = vld [vmem:[%s4403_s1 + $0x240] sm:$0xff]  ;;  %v95_v25 = vld [vmem:[%s4403_s1 + $0x248] sm:$0xff]  ;;  %v2877_v27 = vcombine.low %v103_v16, %v111_v17  ;;  %v136_v16 = vld [vmem:[%s4403_s1 + $0x390] sm:$0xff] }
   0x9   :  { %v2860_v28 = vcombine.high %v86_v22, %v94_v23  ;;  %v2862_v29 = vcombine.high %v87_v24, %v95_v25  ;;  %v70_v30 = vld [vmem:[%s4403_s1 + $0x180] sm:$0xff]  ;;  %v71_v32 = vld [vmem:[%s4403_s1 + $0x188] sm:$0xff]  ;;  %v2859_v34 = vcombine.low %v86_v22, %v94_v23  ;;  %v2861_v35 = vcombine.low %v87_v24, %v95_v25  ;;  %v144_v17 = vld [vmem:[%s4403_s1 + $0x3d0] sm:$0xff] }
   0xa   :  { %1079 = vmatpush1.bf16.msra.mxu0 %v2891_v18  ;;  %1120 = vmatpush1.bf16.msra.mxu1 %v2893_v19  ;;  %v78_v31 = vld [vmem:[%s4403_s1 + $0x1c0] sm:$0xff]  ;;  %v79_v33 = vld [vmem:[%s4403_s1 + $0x1c8] sm:$0xff]  ;;  %v137_v18 = vld [vmem:[%s4403_s1 + $0x398] sm:$0xff]  ;;  %v2912_v22 = vcombine.high %v136_v16, %v144_v17 }
   0xb   :  { %1080 = vmatprep.subr.bf16.mxu0 %v2876_v20  ;;  %1121 = vmatprep.subr.bf16.mxu1 %v2878_v21  ;;  %v2844_v36 = vcombine.high %v70_v30, %v78_v31  ;;  %v3491_v37 = vld [vmem:[%s4404_s0] sm:$0xff]  ;;  %v2846_v38 = vcombine.high %v71_v32, %v79_v33  ;;  %v55_v42 = vld [vmem:[%s4403_s1 + $0x108] sm:$0xff]  ;;  %v2843_v44 = vcombine.low %v70_v30, %v78_v31  ;;  %v145_v19 = vld [vmem:[%s4403_s1 + $0x3d8] sm:$0xff] }
   0xc   :  { %v54_v39 = vld [vmem:[%s4403_s1 + $0x100] sm:$0xff]  ;;  %v3501_v41 = vcombine.high %v3491_v37, %v3491_v37  ;;  %v63_v43 = vld [vmem:[%s4403_s1 + $0x148] sm:$0xff]  ;;  %v2845_v45 = vcombine.low %v71_v32, %v79_v33  ;;  %v2914_v23 = vcombine.high %v137_v18, %v145_v19  ;;  %v120_v24 = vld [vmem:[%s4403_s1 + $0x310] sm:$0xff]  ;;  %v2913_v30 = vcombine.low %v137_v18, %v145_v19 }
   0xd   :  { %v62_v40 = vld [vmem:[%s4403_s1 + $0x140] sm:$0xff]  ;;  %v2830_v47 = vcombine.high %v55_v42, %v63_v43  ;;  %v39_v50 = vld [vmem:[%s4403_s1 + $0x88] sm:$0xff]  ;;  %v2829_v53 = vcombine.low %v55_v42, %v63_v43  ;;  %v128_v25 = vld [vmem:[%s4403_s1 + $0x350] sm:$0xff] }
   0xe   :  { %1081 = vmatpush1.bf16.msra.mxu0 %v2875_v26  ;;  %1122 = vmatpush1.bf16.msra.mxu1 %v2877_v27  ;;  %v2828_v46 = vcombine.high %v54_v39, %v62_v40  ;;  %v38_v48 = vld [vmem:[%s4403_s1 + $0x80] sm:$0xff]  ;;  %v47_v51 = vld [vmem:[%s4403_s1 + $0xc8] sm:$0xff]  ;;  %v2827_v52 = vcombine.low %v54_v39, %v62_v40  ;;  %v3581_v26 = vcombine.low %v3491_v37, %v3491_v37  ;;  %v121_v27 = vld [vmem:[%s4403_s1 + $0x318] sm:$0xff] }
   0xf   :  { %1082 = vmatprep.subr.bf16.mxu0 %v2860_v28  ;;  %1123 = vmatprep.subr.bf16.mxu1 %v2862_v29  ;;  %v46_v49 = vld [vmem:[%s4403_s1 + $0xc0] sm:$0xff]  ;;  %v2814_v55 = vcombine.high %v39_v50, %v47_v51  ;;  %v23_v58 = vld [vmem:[%s4403_s1 + $0x8] sm:$0xff]  ;;  %v2813_v61 = vcombine.low %v39_v50, %v47_v51  ;;  %v129_v28 = vld [vmem:[%s4403_s1 + $0x358] sm:$0xff]  ;;  %v2911_v29 = vcombine.low %v136_v16, %v144_v17 }
  0x10   :  { %2955 = vmatprep.mubr.msk.bf16.mxu0 %vm1072_vm0, %v3501_v41  ;;  %2956 = vmatprep.mubr.msk.bf16.mxu1 %vm1072_vm0, %v3501_v41  ;;  %v2812_v54 = vcombine.high %v38_v48, %v46_v49  ;;  %v22_v56 = vld [vmem:[%s4403_s1] sm:$0xff]  ;;  %v31_v59 = vld [vmem:[%s4403_s1 + $0x48] sm:$0xff]  ;;  %v2811_v60 = vcombine.low %v38_v48, %v46_v49  ;;  %v2896_v31 = vcombine.high %v120_v24, %v128_v25  ;;  %v104_v33 = vld [vmem:[%s4403_s1 + $0x290] sm:$0xff] }
  0x11   :  { %v30_v57 = vld [vmem:[%s4403_s1 + $0x40] sm:$0xff]  ;;  %v2798_v63 = vcombine.high %v23_v58, %v31_v59  ;;  %v167_v2 = vld [vmem:[%s4403_s1 + $0x488] sm:$0xff]  ;;  %v2797_v5 = vcombine.low %v23_v58, %v31_v59  ;;  %v2898_v32 = vcombine.high %v121_v27, %v129_v28  ;;  %v2895_v37 = vcombine.low %v120_v24, %v128_v25  ;;  %v88_v42 = vld [vmem:[%s4403_s1 + $0x210] sm:$0xff] }
  0x12   :  { %1083 = vmatpush1.bf16.msra.mxu0 %v2859_v34  ;;  %1124 = vmatpush1.bf16.msra.mxu1 %v2861_v35  ;;  %v2796_v62 = vcombine.high %v22_v56, %v30_v57  ;;  %v166_v0 = vld [vmem:[%s4403_s1 + $0x480] sm:$0xff]  ;;  %v175_v3 = vld [vmem:[%s4403_s1 + $0x4c8] sm:$0xff]  ;;  %v2795_v4 = vcombine.low %v22_v56, %v30_v57  ;;  %v112_v34 = vld [vmem:[%s4403_s1 + $0x2d0] sm:$0xff] }
  0x13   :  { %1084 = vmatprep.subr.bf16.mxu0 %v2844_v36  ;;  %1125 = vmatprep.subr.bf16.mxu1 %v2846_v38  ;;  %v174_v1 = vld [vmem:[%s4403_s1 + $0x4c0] sm:$0xff]  ;;  %v2942_v7 = vcombine.high %v167_v2, %v175_v3  ;;  %v151_v10 = vld [vmem:[%s4403_s1 + $0x408] sm:$0xff]  ;;  %v2941_v13 = vcombine.low %v167_v2, %v175_v3  ;;  %v105_v35 = vld [vmem:[%s4403_s1 + $0x298] sm:$0xff]  ;;  %v2897_v38 = vcombine.low %v121_v27, %v129_v28 }
  0x14   :  { %v2940_v6 = vcombine.high %v166_v0, %v174_v1  ;;  %v150_v8 = vld [vmem:[%s4403_s1 + $0x400] sm:$0xff]  ;;  %v159_v11 = vld [vmem:[%s4403_s1 + $0x448] sm:$0xff]  ;;  %v2939_v12 = vcombine.low %v166_v0, %v174_v1  ;;  %v113_v36 = vld [vmem:[%s4403_s1 + $0x2d8] sm:$0xff]  ;;  %v2880_v39 = vcombine.high %v104_v33, %v112_v34 }
  0x15   :  { %v158_v9 = vld [vmem:[%s4403_s1 + $0x440] sm:$0xff]  ;;  %v2926_v15 = vcombine.high %v151_v10, %v159_v11  ;;  %v2925_v21 = vcombine.low %v151_v10, %v159_v11  ;;  %v2882_v40 = vcombine.high %v105_v35, %v113_v36  ;;  %v96_v43 = vld [vmem:[%s4403_s1 + $0x250] sm:$0xff] }
  0x16   :  { %1085 = vmatpush1.bf16.msra.mxu0 %v2843_v44  ;;  %1126 = vmatpush1.bf16.msra.mxu1 %v2845_v45  ;;  %v2924_v14 = vcombine.high %v150_v8, %v158_v9  ;;  %v2923_v20 = vcombine.low %v150_v8, %v158_v9  ;;  %v89_v44 = vld [vmem:[%s4403_s1 + $0x218] sm:$0xff]  ;;  %v2864_v48 = vcombine.high %v88_v42, %v96_v43  ;;  %v72_v50 = vld [vmem:[%s4403_s1 + $0x190] sm:$0xff] }
  0x17   :  { %1086 = vmatprep.subr.bf16.mxu0 %v2828_v46  ;;  %1127 = vmatprep.subr.bf16.mxu1 %v2830_v47  ;;  %v97_v45 = vld [vmem:[%s4403_s1 + $0x258] sm:$0xff]  ;;  %v2879_v46 = vcombine.low %v104_v33, %v112_v34  ;;  %v2881_v47 = vcombine.low %v105_v35, %v113_v36  ;;  %v80_v51 = vld [vmem:[%s4403_s1 + $0x1d0] sm:$0xff]  ;;  %v146_v35 = vld [vmem:[%s4403_s1 + $0x3e0] sm:$0xff] }
  0x18   :  { %v2866_v49 = vcombine.high %v89_v44, %v97_v45  ;;  %v2848_v56 = vcombine.high %v72_v50, %v80_v51  ;;  %v56_v57 = vld [vmem:[%s4403_s1 + $0x110] sm:$0xff] }
  0x19   :  { %v64_v58 = vld [vmem:[%s4403_s1 + $0x150] sm:$0xff] }
  0x1a   :  { %1087 = vmatpush1.bf16.msra.mxu0 %v2827_v52  ;;  %1128 = vmatpush1.bf16.msra.mxu1 %v2829_v53  ;;  %v73_v52 = vld [vmem:[%s4403_s1 + $0x198] sm:$0xff]  ;;  %v2832_v1 = vcombine.high %v56_v57, %v64_v58  ;;  %v48_v2 = vld [vmem:[%s4403_s1 + $0xd0] sm:$0xff] }
  0x1b   :  { %1088 = vmatprep.subr.bf16.mxu0 %v2812_v54  ;;  %1129 = vmatprep.subr.bf16.mxu1 %v2814_v55  ;;  %v81_v53 = vld [vmem:[%s4403_s1 + $0x1d8] sm:$0xff]  ;;  %v2863_v54 = vcombine.low %v88_v42, %v96_v43  ;;  %v2865_v55 = vcombine.low %v89_v44, %v97_v45  ;;  %v32_v10 = vld [vmem:[%s4403_s1 + $0x50] sm:$0xff]  ;;  %v130_v42 = vld [vmem:[%s4403_s1 + $0x360] sm:$0xff] }
  0x1c   :  { %v2850_v59 = vcombine.high %v73_v52, %v81_v53  ;;  %v2849_v0 = vcombine.low %v73_v52, %v81_v53  ;;  %v176_v18 = vld [vmem:[%s4403_s1 + $0x4d0] sm:$0xff]  ;;  %v123_v45 = vld [vmem:[%s4403_s1 + $0x328] sm:$0xff] }
  0x1d   :  { %v160_v27 = vld [vmem:[%s4403_s1 + $0x450] sm:$0xff]  ;;  %v107_v53 = vld [vmem:[%s4403_s1 + $0x2a8] sm:$0xff] }
  0x1e   :  { %1089 = vmatpush1.bf16.msra.mxu0 %v2811_v60  ;;  %1130 = vmatpush1.bf16.msra.mxu1 %v2813_v61  ;;  %v57_v60 = vld [vmem:[%s4403_s1 + $0x118] sm:$0xff] }
  0x1f   :  { %1090 = vmatprep.subr.bf16.mxu0 %v2796_v62  ;;  %1131 = vmatprep.subr.bf16.mxu1 %v2798_v63  ;;  %v65_v61 = vld [vmem:[%s4403_s1 + $0x158] sm:$0xff]  ;;  %v2847_v62 = vcombine.low %v72_v50, %v80_v51  ;;  %v40_v63 = vld [vmem:[%s4403_s1 + $0x90] sm:$0xff]  ;;  %v114_v50 = vld [vmem:[%s4403_s1 + $0x2e0] sm:$0xff] }
  0x20   :  { %v2834_v3 = vcombine.high %v57_v60, %v65_v61  ;;  %v2833_v8 = vcombine.low %v57_v60, %v65_v61  ;;  %v2816_v9 = vcombine.high %v40_v63, %v48_v2  ;;  %v91_v61 = vld [vmem:[%s4403_s1 + $0x228] sm:$0xff] }
  0x22   :  { %1091 = vmatpush1.bf16.msra.mxu0 %v2795_v4  ;;  %1132 = vmatpush1.bf16.msra.mxu1 %v2797_v5  ;;  %v41_v4 = vld [vmem:[%s4403_s1 + $0x98] sm:$0xff] }
  0x23   :  { %1104 = vmatprep.subr.bf16.mxu0 %v2940_v6  ;;  %1145 = vmatprep.subr.bf16.mxu1 %v2942_v7  ;;  %v49_v5 = vld [vmem:[%s4403_s1 + $0xd8] sm:$0xff]  ;;  %v2831_v6 = vcombine.low %v56_v57, %v64_v58  ;;  %v24_v7 = vld [vmem:[%s4403_s1 + $0x10] sm:$0xff]  ;;  %v90_v57 = vld [vmem:[%s4403_s1 + $0x220] sm:$0xff] }
  0x24   :  { %v2818_v11 = vcombine.high %v41_v4, %v49_v5  ;;  %v2817_v16 = vcombine.low %v41_v4, %v49_v5  ;;  %v2800_v17 = vcombine.high %v24_v7, %v32_v10  ;;  %v98_v58 = vld [vmem:[%s4403_s1 + $0x260] sm:$0xff]  ;;  %v75_v5 = vld [vmem:[%s4403_s1 + $0x1a8] sm:$0xff] }
  0x25   :  { %v2868_v4 = vcombine.high %v90_v57, %v98_v58 }
  0x26   :  { %1105 = vmatpush2.bf16.msra.mxu0 %v2939_v12  ;;  %1146 = vmatpush2.bf16.msra.mxu1 %v2941_v13  ;;  %v25_v12 = vld [vmem:[%s4403_s1 + $0x18] sm:$0xff] }
  0x27   :  { %1106 = vmatprep.subr.bf16.mxu0 %v2924_v14  ;;  %1147 = vmatprep.subr.bf16.mxu1 %v2926_v15  ;;  %v33_v13 = vld [vmem:[%s4403_s1 + $0x58] sm:$0xff]  ;;  %v2815_v14 = vcombine.low %v40_v63, %v48_v2  ;;  %v168_v15 = vld [vmem:[%s4403_s1 + $0x490] sm:$0xff]  ;;  %v82_v2 = vld [vmem:[%s4403_s1 + $0x1e0] sm:$0xff] }
  0x28   :  { %v2802_v19 = vcombine.high %v25_v12, %v33_v13  ;;  %v2801_v24 = vcombine.low %v25_v12, %v33_v13  ;;  %v2944_v25 = vcombine.high %v168_v15, %v176_v18  ;;  %v59_v13 = vld [vmem:[%s4403_s1 + $0x128] sm:$0xff] }
  0x2a   :  { %1107 = vmatpush2.bf16.msra.mxu0 %v2923_v20  ;;  %1148 = vmatpush2.bf16.msra.mxu1 %v2925_v21  ;;  %v169_v20 = vld [vmem:[%s4403_s1 + $0x498] sm:$0xff] }
  0x2b   :  { %1158 = vmatprep.subr.bf16.mxu0 %v2912_v22  ;;  %1199 = vmatprep.subr.bf16.mxu1 %v2914_v23  ;;  %v177_v21 = vld [vmem:[%s4403_s1 + $0x4d8] sm:$0xff]  ;;  %v2799_v22 = vcombine.low %v24_v7, %v32_v10  ;;  %v152_v23 = vld [vmem:[%s4403_s1 + $0x410] sm:$0xff]  ;;  %v66_v10 = vld [vmem:[%s4403_s1 + $0x160] sm:$0xff] }
  0x2c   :  { %v2946_v28 = vcombine.high %v169_v20, %v177_v21  ;;  %v2945_v33 = vcombine.low %v169_v20, %v177_v21  ;;  %v2928_v34 = vcombine.high %v152_v23, %v160_v27  ;;  %v43_v21 = vld [vmem:[%s4403_s1 + $0xa8] sm:$0xff] }
  0x2d   :  { %1109 = vmatmul.mubr.bf16.vlgmr.msra.gmra.mxu0 %v3581_v26  ;;  %1150 = vmatmul.mubr.bf16.vlgmr.msra.gmra.mxu1 %v3581_v26 }
  0x2e   :  { %1159 = vmatpush1.bf16.msra.mxu0 %v2911_v29  ;;  %1200 = vmatpush1.bf16.msra.mxu1 %v2913_v30  ;;  %v153_v29 = vld [vmem:[%s4403_s1 + $0x418] sm:$0xff] }
  0x2f   :  { %1160 = vmatprep.subr.bf16.mxu0 %v2896_v31  ;;  %1201 = vmatprep.subr.bf16.mxu1 %v2898_v32  ;;  %v161_v30 = vld [vmem:[%s4403_s1 + $0x458] sm:$0xff]  ;;  %v2943_v31 = vcombine.low %v168_v15, %v176_v18  ;;  %v138_v32 = vld [vmem:[%s4403_s1 + $0x3a0] sm:$0xff] }
  0x30   :  { %2957 = vmatprep.mubr.msk.bf16.mxu0 %vm1072_vm0, %v3501_v41  ;;  %2958 = vmatprep.mubr.msk.bf16.mxu1 %vm1072_vm0, %v3501_v41  ;;  %v2930_v36 = vcombine.high %v153_v29, %v161_v30  ;;  %v2929_v43 = vcombine.low %v153_v29, %v161_v30  ;;  %v2916_v44 = vcombine.high %v138_v32, %v146_v35  ;;  %v50_v18 = vld [vmem:[%s4403_s1 + $0xe0] sm:$0xff]  ;;  %v27_v30 = vld [vmem:[%s4403_s1 + $0x28] sm:$0xff] }
  0x32   :  { %1161 = vmatpush1.bf16.msra.mxu0 %v2895_v37  ;;  %1202 = vmatpush1.bf16.msra.mxu1 %v2897_v38  ;;  %v139_v37 = vld [vmem:[%s4403_s1 + $0x3a8] sm:$0xff] }
  0x33   :  { %1162 = vmatprep.subr.bf16.mxu0 %v2880_v39  ;;  %1203 = vmatprep.subr.bf16.mxu1 %v2882_v40  ;;  %v147_v38 = vld [vmem:[%s4403_s1 + $0x3e8] sm:$0xff]  ;;  %v2927_v39 = vcombine.low %v152_v23, %v160_v27  ;;  %v122_v40 = vld [vmem:[%s4403_s1 + $0x320] sm:$0xff] }
  0x34   :  { %v2917_v51 = vcombine.low %v139_v37, %v147_v38  ;;  %v2900_v52 = vcombine.high %v122_v40, %v130_v42  ;;  %v34_v27 = vld [vmem:[%s4403_s1 + $0x60] sm:$0xff] }
  0x36   :  { %1163 = vmatpush1.bf16.msra.mxu0 %v2879_v46  ;;  %1204 = vmatpush1.bf16.msra.mxu1 %v2881_v47  ;;  %v131_v46 = vld [vmem:[%s4403_s1 + $0x368] sm:$0xff]  ;;  %v2918_v47 = vcombine.high %v139_v37, %v147_v38 }
  0x37   :  { %1164 = vmatprep.subr.bf16.mxu0 %v2864_v48  ;;  %1205 = vmatprep.subr.bf16.mxu1 %v2866_v49  ;;  %v2915_v48 = vcombine.low %v138_v32, %v146_v35  ;;  %v106_v49 = vld [vmem:[%s4403_s1 + $0x2a0] sm:$0xff]  ;;  %v171_v38 = vld [vmem:[%s4403_s1 + $0x4a8] sm:$0xff] }
  0x38   :  { %v2884_v60 = vcombine.high %v106_v49, %v114_v50  ;;  %v178_v35 = vld [vmem:[%s4403_s1 + $0x4e0] sm:$0xff] }
  0x3a   :  { %1165 = vmatpush1.bf16.msra.mxu0 %v2863_v54  ;;  %1206 = vmatpush1.bf16.msra.mxu1 %v2865_v55  ;;  %v115_v54 = vld [vmem:[%s4403_s1 + $0x2e8] sm:$0xff]  ;;  %v2902_v55 = vcombine.high %v123_v45, %v131_v46 }
  0x3b   :  { %1166 = vmatprep.subr.bf16.mxu0 %v2848_v56  ;;  %1207 = vmatprep.subr.bf16.mxu1 %v2850_v59  ;;  %v2899_v56 = vcombine.low %v122_v40, %v130_v42  ;;  %v2901_v59 = vcombine.low %v123_v45, %v131_v46  ;;  %v2886_v63 = vcombine.high %v107_v53, %v115_v54  ;;  %v179_v40 = vld [vmem:[%s4403_s1 + $0x4e8] sm:$0xff] }
  0x3e   :  { %1167 = vmatpush1.bf16.msra.mxu0 %v2847_v62  ;;  %1208 = vmatpush1.bf16.msra.mxu1 %v2849_v0  ;;  %v99_v62 = vld [vmem:[%s4403_s1 + $0x268] sm:$0xff]  ;;  %v2883_v0 = vcombine.low %v106_v49, %v114_v50  ;;  %v2950_v49 = vcombine.high %v171_v38, %v179_v40 }
  0x3f   :  { %1168 = vmatprep.subr.bf16.mxu0 %v2832_v1  ;;  %1209 = vmatprep.subr.bf16.mxu1 %v2834_v3  ;;  %v74_v1 = vld [vmem:[%s4403_s1 + $0x1a0] sm:$0xff]  ;;  %v2885_v3 = vcombine.low %v107_v53, %v115_v54  ;;  %v2870_v7 = vcombine.high %v91_v61, %v99_v62  ;;  %v2949_v53 = vcombine.low %v171_v38, %v179_v40  ;;  %v45_v40 = vld [vmem:[%s4403_s1 + $0xb8] sm:$0xff] }
  0x40   :  { %v2852_v12 = vcombine.high %v74_v1, %v82_v2 }
  0x42   :  { %1169 = vmatpush1.bf16.msra.mxu0 %v2831_v6  ;;  %1210 = vmatpush1.bf16.msra.mxu1 %v2833_v8  ;;  %v83_v6 = vld [vmem:[%s4403_s1 + $0x1e8] sm:$0xff]  ;;  %v2867_v8 = vcombine.low %v90_v57, %v98_v58 }
  0x43   :  { %1170 = vmatprep.subr.bf16.mxu0 %v2816_v9  ;;  %1211 = vmatprep.subr.bf16.mxu1 %v2818_v11  ;;  %v58_v9 = vld [vmem:[%s4403_s1 + $0x120] sm:$0xff]  ;;  %v2869_v11 = vcombine.low %v91_v61, %v99_v62  ;;  %v2854_v15 = vcombine.high %v75_v5, %v83_v6  ;;  %v124_v62 = vld [vmem:[%s4403_s1 + $0x330] sm:$0xff] }
  0x44   :  { %v2836_v20 = vcombine.high %v58_v9, %v66_v10 }
  0x46   :  { %1171 = vmatpush1.bf16.msra.mxu0 %v2815_v14  ;;  %1212 = vmatpush1.bf16.msra.mxu1 %v2817_v16  ;;  %v67_v14 = vld [vmem:[%s4403_s1 + $0x168] sm:$0xff]  ;;  %v2851_v16 = vcombine.low %v74_v1, %v82_v2  ;;  %v133_v1 = vld [vmem:[%s4403_s1 + $0x378] sm:$0xff] }
  0x47   :  { %1172 = vmatprep.subr.bf16.mxu0 %v2800_v17  ;;  %1213 = vmatprep.subr.bf16.mxu1 %v2802_v19  ;;  %v42_v17 = vld [vmem:[%s4403_s1 + $0xa0] sm:$0xff]  ;;  %v2853_v19 = vcombine.low %v75_v5, %v83_v6  ;;  %v2838_v23 = vcombine.high %v59_v13, %v67_v14 }
  0x48   :  { %v2820_v29 = vcombine.high %v42_v17, %v50_v18 }
  0x4a   :  { %1173 = vmatpush1.bf16.msra.mxu0 %v2799_v22  ;;  %1214 = vmatpush1.bf16.msra.mxu1 %v2801_v24  ;;  %v51_v22 = vld [vmem:[%s4403_s1 + $0xe8] sm:$0xff]  ;;  %v2835_v24 = vcombine.low %v58_v9, %v66_v10  ;;  %v117_v9 = vld [vmem:[%s4403_s1 + $0x2f8] sm:$0xff] }
  0x4b   :  { %1186 = vmatprep.subr.bf16.mxu0 %v2944_v25  ;;  %1227 = vmatprep.subr.bf16.mxu1 %v2946_v28  ;;  %v26_v25 = vld [vmem:[%s4403_s1 + $0x20] sm:$0xff]  ;;  %v2837_v28 = vcombine.low %v59_v13, %v67_v14  ;;  %v2822_v32 = vcombine.high %v43_v21, %v51_v22 }
  0x4c   :  { %v2804_v37 = vcombine.high %v26_v25, %v34_v27  ;;  %v2803_v42 = vcombine.low %v26_v25, %v34_v27  ;;  %v60_v27 = vld [vmem:[%s4403_s1 + $0x130] sm:$0xff] }
  0x4e   :  { %1187 = vmatpush2.bf16.msra.mxu0 %v2943_v31  ;;  %1228 = vmatpush2.bf16.msra.mxu1 %v2945_v33  ;;  %v35_v31 = vld [vmem:[%s4403_s1 + $0x68] sm:$0xff]  ;;  %v2819_v33 = vcombine.low %v42_v17, %v50_v18  ;;  %v101_v17 = vld [vmem:[%s4403_s1 + $0x278] sm:$0xff] }
  0x4f   :  { %1188 = vmatprep.subr.bf16.mxu0 %v2928_v34  ;;  %1229 = vmatprep.subr.bf16.mxu1 %v2930_v36  ;;  %v170_v34 = vld [vmem:[%s4403_s1 + $0x4a0] sm:$0xff]  ;;  %v2821_v36 = vcombine.low %v43_v21, %v51_v22  ;;  %v2805_v45 = vcombine.low %v27_v30, %v35_v31 }
  0x50   :  { %v2948_v46 = vcombine.high %v170_v34, %v178_v35  ;;  %v2947_v50 = vcombine.low %v170_v34, %v178_v35  ;;  %v44_v35 = vld [vmem:[%s4403_s1 + $0xb0] sm:$0xff] }
  0x52   :  { %1189 = vmatpush2.bf16.msra.mxu0 %v2927_v39  ;;  %1230 = vmatpush2.bf16.msra.mxu1 %v2929_v43  ;;  %v2806_v39 = vcombine.high %v27_v30, %v35_v31  ;;  %v154_v43 = vld [vmem:[%s4403_s1 + $0x420] sm:$0xff]  ;;  %v68_v31 = vld [vmem:[%s4403_s1 + $0x170] sm:$0xff] }
  0x53   :  { %1240 = vmatprep.subr.bf16.mxu0 %v2916_v44  ;;  %1281 = vmatprep.subr.bf16.mxu1 %v2918_v47  ;;  %v162_v44 = vld [vmem:[%s4403_s1 + $0x460] sm:$0xff]  ;;  %v155_v47 = vld [vmem:[%s4403_s1 + $0x428] sm:$0xff]  ;;  %v2840_v38 = vcombine.high %v60_v27, %v68_v31 }
  0x54   :  { %v2932_v54 = vcombine.high %v154_v43, %v162_v44  ;;  %v2931_v58 = vcombine.low %v154_v43, %v162_v44  ;;  %v2839_v43 = vcombine.low %v60_v27, %v68_v31  ;;  %v28_v44 = vld [vmem:[%s4403_s1 + $0x30] sm:$0xff]  ;;  %v3289_v27 = vld [vmem:[%s4405_s3 + $0x98] sm:$0xff]  }
  0x55   :  { %1191 = vmatmul.mubr.bf16.vlgmr.msra.gmra.mxu0 %v3581_v26  ;;  %1232 = vmatmul.mubr.bf16.vlgmr.msra.gmra.mxu1 %v3581_v26  ;;  %v3293_v31 = vld [vmem:[%s4405_s3 + $0x90] sm:$0xff]  }
  0x56   :  { %1241 = vmatpush1.bf16.msra.mxu0 %v2915_v48  ;;  %1282 = vmatpush1.bf16.msra.mxu1 %v2917_v51  ;;  %v163_v48 = vld [vmem:[%s4403_s1 + $0x468] sm:$0xff]  ;;  %v140_v51 = vld [vmem:[%s4403_s1 + $0x3b0] sm:$0xff] }
  0x57   :  { %1242 = vmatprep.subr.bf16.mxu0 %v2900_v52  ;;  %1283 = vmatprep.subr.bf16.mxu1 %v2902_v55  ;;  %v148_v52 = vld [vmem:[%s4403_s1 + $0x3f0] sm:$0xff]  ;;  %v141_v55 = vld [vmem:[%s4403_s1 + $0x3b8] sm:$0xff]  ;;  %v2934_v57 = vcombine.high %v155_v47, %v163_v48 }
  0x58   :  { %2959 = vmatprep.mubr.msk.bf16.mxu0 %vm1072_vm0, %v3501_v41  ;;  %2960 = vmatprep.mubr.msk.bf16.mxu1 %vm1072_vm0, %v3501_v41  ;;  %v2919_v2 = vcombine.low %v140_v51, %v148_v52 }
  0x5a   :  { %1243 = vmatpush1.bf16.msra.mxu0 %v2899_v56  ;;  %1284 = vmatpush1.bf16.msra.mxu1 %v2901_v59  ;;  %v149_v56 = vld [vmem:[%s4403_s1 + $0x3f8] sm:$0xff]  ;;  %v2933_v59 = vcombine.low %v155_v47, %v163_v48 }
  0x5b   :  { %1244 = vmatprep.subr.bf16.mxu0 %v2884_v60  ;;  %1285 = vmatprep.subr.bf16.mxu1 %v2886_v63  ;;  %v2920_v60 = vcombine.high %v140_v51, %v148_v52  ;;  %v2922_v61 = vcombine.high %v141_v55, %v149_v56  ;;  %v132_v63 = vld [vmem:[%s4403_s1 + $0x370] sm:$0xff]  ;;  %v29_v48 = vld [vmem:[%s4403_s1 + $0x38] sm:$0xff] }
  0x5c   :  { %v2904_v5 = vcombine.high %v124_v62, %v132_v63  ;;  %v2903_v10 = vcombine.low %v124_v62, %v132_v63  ;;  %v172_v52 = vld [vmem:[%s4403_s1 + $0x4b0] sm:$0xff] }
  0x5e   :  { %1245 = vmatpush1.bf16.msra.mxu0 %v2883_v0  ;;  %1286 = vmatpush1.bf16.msra.mxu1 %v2885_v3  ;;  %v125_v0 = vld [vmem:[%s4403_s1 + $0x338] sm:$0xff]  ;;  %v108_v3 = vld [vmem:[%s4403_s1 + $0x2b0] sm:$0xff] }
  0x5f   :  { %1246 = vmatprep.subr.bf16.mxu0 %v2868_v4  ;;  %1287 = vmatprep.subr.bf16.mxu1 %v2870_v7  ;;  %v2921_v4 = vcombine.low %v141_v55, %v149_v56  ;;  %v2906_v6 = vcombine.high %v125_v0, %v133_v1  ;;  %v116_v7 = vld [vmem:[%s4403_s1 + $0x2f0] sm:$0xff]  ;;  %v173_v56 = vld [vmem:[%s4403_s1 + $0x4b8] sm:$0xff] }
  0x60   :  { %v2888_v13 = vcombine.high %v108_v3, %v116_v7  ;;  %v2887_v18 = vcombine.low %v108_v3, %v116_v7  ;;  %v3270_v7 = vld [vmem:[%s4405_s3 + $0x78] sm:$0xff]  }
  0x62   :  { %1247 = vmatpush1.bf16.msra.mxu0 %v2867_v8  ;;  %1288 = vmatpush1.bf16.msra.mxu1 %v2869_v11  ;;  %v109_v8 = vld [vmem:[%s4403_s1 + $0x2b8] sm:$0xff]  ;;  %v92_v11 = vld [vmem:[%s4403_s1 + $0x230] sm:$0xff] }
  0x63   :  { %1248 = vmatprep.subr.bf16.mxu0 %v2852_v12  ;;  %1289 = vmatprep.subr.bf16.mxu1 %v2854_v15  ;;  %v2905_v12 = vcombine.low %v125_v0, %v133_v1  ;;  %v2890_v14 = vcombine.high %v109_v8, %v117_v9  ;;  %v100_v15 = vld [vmem:[%s4403_s1 + $0x270] sm:$0xff]  ;;  %v157_v0 = vld [vmem:[%s4403_s1 + $0x438] sm:$0xff] }
  0x64   :  { %v2872_v21 = vcombine.high %v92_v11, %v100_v15  ;;  %v2871_v25 = vcombine.low %v92_v11, %v100_v15  ;;  %v165_v1 = vld [vmem:[%s4403_s1 + $0x478] sm:$0xff]  ;;  %v3276_v15 = vld [vmem:[%s4405_s3 + $0x30] sm:$0xff]  }
  0x65   :  { %v3272_v11 = vld [vmem:[%s4405_s3 + $0x38] sm:$0xff]  }
  0x66   :  { %1249 = vmatpush1.bf16.msra.mxu0 %v2851_v16  ;;  %1290 = vmatpush1.bf16.msra.mxu1 %v2853_v19  ;;  %v93_v16 = vld [vmem:[%s4403_s1 + $0x238] sm:$0xff]  ;;  %v76_v19 = vld [vmem:[%s4403_s1 + $0x1b0] sm:$0xff] }
  0x67   :  { %1250 = vmatprep.subr.bf16.mxu0 %v2836_v20  ;;  %1291 = vmatprep.subr.bf16.mxu1 %v2838_v23  ;;  %v2889_v20 = vcombine.low %v109_v8, %v117_v9  ;;  %v2874_v22 = vcombine.high %v93_v16, %v101_v17  ;;  %v84_v23 = vld [vmem:[%s4403_s1 + $0x1f0] sm:$0xff]  ;;  %v2937_v9 = vcombine.low %v157_v0, %v165_v1 }
  0x68   :  { %v2855_v34 = vcombine.low %v76_v19, %v84_v23 }
  0x6a   :  { %1251 = vmatpush1.bf16.msra.mxu0 %v2835_v24  ;;  %1292 = vmatpush1.bf16.msra.mxu1 %v2837_v28  ;;  %v85_v24 = vld [vmem:[%s4403_s1 + $0x1f8] sm:$0xff]  ;;  %v2873_v28 = vcombine.low %v93_v16, %v101_v17  ;;  %v3277_v16 = vld [vmem:[%s4405_s3 + $0xb0] sm:$0xff]   ;;  %v3278_v17 = vld [vmem:[%s4405_s3 + $0x68] sm:$0xff]  }
  0x6b   :  { %1252 = vmatprep.subr.bf16.mxu0 %v2820_v29  ;;  %1293 = vmatprep.subr.bf16.mxu1 %v2822_v32  ;;  %v2856_v29 = vcombine.high %v76_v19, %v84_v23  ;;  %v61_v32 = vld [vmem:[%s4403_s1 + $0x138] sm:$0xff]  ;;  %v3281_v19 = vld [vmem:[%s4405_s3 + $0xa8] sm:$0xff]   ;;  %v3285_v23 = vld [vmem:[%s4405_s3 + $0xa0] sm:$0xff]  }
  0x6e   :  { %1253 = vmatpush1.bf16.msra.mxu0 %v2819_v33  ;;  %1294 = vmatpush1.bf16.msra.mxu1 %v2821_v36  ;;  %v69_v33 = vld [vmem:[%s4403_s1 + $0x178] sm:$0xff]  ;;  %v52_v36 = vld [vmem:[%s4403_s1 + $0xf0] sm:$0xff] }
  0x6f   :  { %1254 = vmatprep.subr.bf16.mxu0 %v2804_v37  ;;  %1295 = vmatprep.subr.bf16.mxu1 %v2806_v39  ;;  %v2842_v39 = vcombine.high %v61_v32, %v69_v33  ;;  %v2824_v47 = vcombine.high %v44_v35, %v52_v36  ;;  %v2823_v51 = vcombine.low %v44_v35, %v52_v36  ;;  %v3297_v35 = vld [vmem:[%s4405_s3 + $0x88] sm:$0xff]   ;;  %v3298_v36 = vld [vmem:[%s4405_s3 + $0x40] sm:$0xff]  }
  0x72   :  { %1255 = vmatpush1.bf16.msra.mxu0 %v2803_v42  ;;  %1296 = vmatpush1.bf16.msra.mxu1 %v2805_v45  ;;  %v53_v42 = vld [vmem:[%s4403_s1 + $0xf8] sm:$0xff]  ;;  %v36_v45 = vld [vmem:[%s4403_s1 + $0x70] sm:$0xff] }
  0x73   :  { %1268 = vmatprep.subr.bf16.mxu0 %v2948_v46  ;;  %1309 = vmatprep.subr.bf16.mxu1 %v2950_v49  ;;  %v2841_v46 = vcombine.low %v61_v32, %v69_v33  ;;  %v37_v49 = vld [vmem:[%s4403_s1 + $0x78] sm:$0xff]  ;;  %v2808_v55 = vcombine.high %v28_v44, %v36_v45  ;;  %v3294_v32 = vld [vmem:[%s4405_s3 + $0x48] sm:$0xff]  }
  0x74   :  { %v2809_v62 = vcombine.low %v29_v48, %v37_v49  ;;  %v3295_v33 = vld [vmem:[%s4405_s3 + $0xc8] sm:$0xff]  }
  0x76   :  { %1269 = vmatpush2.bf16.msra.mxu0 %v2947_v50  ;;  %1310 = vmatpush2.bf16.msra.mxu1 %v2949_v53  ;;  %v2826_v50 = vcombine.high %v45_v40, %v53_v42  ;;  %v180_v53 = vld [vmem:[%s4403_s1 + $0x4f0] sm:$0xff] }
  0x77   :  { %1270 = vmatprep.subr.bf16.mxu0 %v2932_v54  ;;  %1311 = vmatprep.subr.bf16.mxu1 %v2934_v57  ;;  %v2825_v54 = vcombine.low %v45_v40, %v53_v42  ;;  %v2810_v57 = vcombine.high %v29_v48, %v37_v49  ;;  %v2952_v63 = vcombine.high %v172_v52, %v180_v53  ;;  %v3302_v40 = vld [vmem:[%s4405_s3 + $0x178] sm:$0xff]  }
  0x78   :  { %v2951_v3 = vcombine.low %v172_v52, %v180_v53  ;;  %v3303_v42 = vld [vmem:[%s4405_s3 + $0x1f8] sm:$0xff]  }
  0x7a   :  { %1271 = vmatpush2.bf16.msra.mxu0 %v2931_v58  ;;  %1312 = vmatpush2.bf16.msra.mxu1 %v2933_v59  ;;  %v181_v58 = vld [vmem:[%s4403_s1 + $0x4f8] sm:$0xff]  ;;  %v2807_v59 = vcombine.low %v28_v44, %v36_v45 }
  0x7b   :  { %1322 = vmatprep.subr.bf16.mxu0 %v2920_v60  ;;  %1363 = vmatprep.subr.bf16.mxu1 %v2922_v61  ;;  %v156_v60 = vld [vmem:[%s4403_s1 + $0x430] sm:$0xff] }
  0x7c   :  { %v164_v61 = vld [vmem:[%s4403_s1 + $0x470] sm:$0xff] }
  0x7d   :  { %1273 = vmatmul.mubr.bf16.vlgmr.msra.gmra.mxu0 %v3581_v26  ;;  %1314 = vmatmul.mubr.bf16.vlgmr.msra.gmra.mxu1 %v3581_v26  ;;  %v2935_v8 = vcombine.low %v156_v60, %v164_v61 }
  0x7e   :  { %1323 = vmatpush1.bf16.msra.mxu0 %v2919_v2  ;;  %1364 = vmatpush1.bf16.msra.mxu1 %v2921_v4  ;;  %v2954_v2 = vcombine.high %v173_v56, %v181_v58  ;;  %v2953_v4 = vcombine.low %v173_v56, %v181_v58 }
  0x7f   :  { %1324 = vmatprep.subr.bf16.mxu0 %v2904_v5  ;;  %1365 = vmatprep.subr.bf16.mxu1 %v2906_v6  ;;  %v2936_v5 = vcombine.high %v156_v60, %v164_v61  ;;  %v2938_v6 = vcombine.high %v157_v0, %v165_v1 }
  0x80   :  { %2961 = vmatprep.mubr.msk.bf16.mxu0 %vm1072_vm0, %v3501_v41  ;;  %2962 = vmatprep.mubr.msk.bf16.mxu1 %vm1072_vm0, %v3501_v41  ;;  %v77_v41 = vld [vmem:[%s4403_s1 + $0x1b8] sm:$0xff] }
  0x81   :  { %v2858_v30 = vcombine.high %v77_v41, %v85_v24  ;;  %v2857_v37 = vcombine.low %v77_v41, %v85_v24  ;;  %v3286_v41 = vld [vmem:[%s4405_s3 + $0x58] sm:$0xff]  }
  0x82   :  { %1325 = vmatpush1.bf16.msra.mxu0 %v2903_v10  ;;  %1366 = vmatpush1.bf16.msra.mxu1 %v2905_v12  ;;  %v3271_v10 = vld [vmem:[%s4405_s3 + $0xf8] sm:$0xff]  }
  0x83   :  { %1326 = vmatprep.subr.bf16.mxu0 %v2888_v13  ;;  %1367 = vmatprep.subr.bf16.mxu1 %v2890_v14  ;;  %v3273_v12 = vld [vmem:[%s4405_s3 + $0xb8] sm:$0xff]   ;;  %v3274_v13 = vld [vmem:[%s4405_s3 + $0x70] sm:$0xff]  }
  0x84   :  { %v3275_v14 = vld [vmem:[%s4405_s3 + $0xf0] sm:$0xff]   ;;  %v3287_v24 = vld [vmem:[%s4405_s3 + $0xd8] sm:$0xff]  }
  0x86   :  { %1327 = vmatpush1.bf16.msra.mxu0 %v2887_v18  ;;  %1368 = vmatpush1.bf16.msra.mxu1 %v2889_v20  ;;  %v3280_v18 = vld [vmem:[%s4405_s3 + $0x28] sm:$0xff]   ;;  %v3282_v20 = vld [vmem:[%s4405_s3 + $0x60] sm:$0xff]  }
  0x87   :  { %1328 = vmatprep.subr.bf16.mxu0 %v2872_v21  ;;  %1369 = vmatprep.subr.bf16.mxu1 %v2874_v22  ;;  %v3283_v21 = vld [vmem:[%s4405_s3 + $0xe0] sm:$0xff]  }
  0x88   :  { %v3284_v22 = vld [vmem:[%s4405_s3 + $0x20] sm:$0xff]  }
  0x8a   :  { %1329 = vmatpush1.bf16.msra.mxu0 %v2871_v25  ;;  %1370 = vmatpush1.bf16.msra.mxu1 %v2873_v28  ;;  %v3288_v25 = vld [vmem:[%s4405_s3 + $0x18] sm:$0xff]   ;;  %v3290_v28 = vld [vmem:[%s4405_s3 + $0x50] sm:$0xff]  }
  0x8b   :  { %1330 = vmatprep.subr.bf16.mxu0 %v2856_v29  ;;  %1371 = vmatprep.subr.bf16.mxu1 %v2858_v30  ;;  %v3291_v29 = vld [vmem:[%s4405_s3 + $0xd0] sm:$0xff]  }
  0x8c   :  { %v3292_v30 = vld [vmem:[%s4405_s3 + $0x10] sm:$0xff]  }
  0x8e   :  { %1331 = vmatpush1.bf16.msra.mxu0 %v2855_v34  ;;  %1372 = vmatpush1.bf16.msra.mxu1 %v2857_v37  ;;  %v3296_v34 = vld [vmem:[%s4405_s3 + $0x8] sm:$0xff]   ;;  %v3299_v37 = vld [vmem:[%s4405_s3 + $0xc0] sm:$0xff]  }
  0x8f   :  { %1332 = vmatprep.subr.bf16.mxu0 %v2840_v38  ;;  %1373 = vmatprep.subr.bf16.mxu1 %v2842_v39  ;;  %v3300_v38 = vld [vmem:[%s4405_s3] sm:$0xff]  }
  0x90   :  { %v3301_v39 = vld [vmem:[%s4405_s3 + $0x80] sm:$0xff]  }
  0x92   :  { %1333 = vmatpush1.bf16.msra.mxu0 %v2839_v43  ;;  %1374 = vmatpush1.bf16.msra.mxu1 %v2841_v46  ;;  %v186_v43 = vlaneseq  ;;  %v4053_v46 = vld [vmem:[%s4406_s2] sm:$0xff] }
  0x93   :  { %1334 = vmatprep.subr.bf16.mxu0 %v2824_v47  ;;  %1375 = vmatprep.subr.bf16.mxu1 %v2826_v50 }
  0x94   :  { %v4047_v44 = vshrl.u32 %v186_v43, 7  ;;  %v3333_v43 = vld [vmem:[%s4405_s3 + $0x180] sm:$0xff]  }
  0x96   :  { %1335 = vmatpush1.bf16.msra.mxu0 %v2823_v51  ;;  %1376 = vmatpush1.bf16.msra.mxu1 %v2825_v54  ;;  %v188_v45 = vsub.s32 0, %v4047_v44  ;;  %v196_v47 = vsub.s32 2, %v4047_v44  ;;  %v192_v48 = vsub.s32 1, %v4047_v44  ;;  %v200_v49 = vsub.s32 3, %v4047_v44 }
  0x97   :  { %1336 = vmatprep.subr.bf16.mxu0 %v2808_v55  ;;  %1377 = vmatprep.subr.bf16.mxu1 %v2810_v57 }
  0x98   :  { %v189_v50 = vrot.slane %v4053_v46, %v188_v45  ;;  %v197_v51 = vrot.slane %v4053_v46, %v196_v47  ;;  %v193_v52 = vrot.slane %v4053_v46, %v192_v48  ;;  %v201_v54 = vrot.slane %v4053_v46, %v200_v49 }
  0x9a   :  { %1337 = vmatpush1.bf16.msra.mxu0 %v2807_v59  ;;  %1378 = vmatpush1.bf16.msra.mxu1 %v2809_v62 }
  0x9b   :  { %1350 = vmatprep.subr.bf16.mxu0 %v2952_v63  ;;  %1391 = vmatprep.subr.bf16.mxu1 %v2954_v2 }
  0x9e   :  { %1351 = vmatpush2.bf16.msra.mxu0 %v2951_v3  ;;  %1392 = vmatpush2.bf16.msra.mxu1 %v2953_v4 }
  0x9f   :  { %1352 = vmatprep.subr.bf16.mxu0 %v2936_v5  ;;  %1393 = vmatprep.subr.bf16.mxu1 %v2938_v6 }
  0xa2   :  { %1353 = vmatpush2.bf16.msra.mxu0 %v2935_v8  ;;  %1394 = vmatpush2.bf16.msra.mxu1 %v2937_v9  ;;  %v3304_v8 = vld [vmem:[%s4405_s3 + $0x138] sm:$0xff]  }
  0xa3   :  { %3092 = vmatprep.subr.bf16.mxu0 %v3270_v7  ;;  %3114 = vmatprep.subr.bf16.mxu1 %v3271_v10 }
  0xa5   :  { %1355 = vmatmul.mubr.bf16.vlgmr.msra.gmra.mxu0 %v3581_v26  ;;  %1396 = vmatmul.mubr.bf16.vlgmr.msra.gmra.mxu1 %v3581_v26  ;;  %v3279_v26 = vld [vmem:[%s4405_s3 + $0xe8] sm:$0xff]  }
  0xa6   :  { %3093 = vmatpush3.bf16.msra.mxu0 %v3272_v11  ;;  %3115 = vmatpush3.bf16.msra.mxu1 %v3273_v12  ;;  %v3305_v11 = vld [vmem:[%s4405_s3 + $0x1b8] sm:$0xff]   ;;  %v3306_v12 = vld [vmem:[%s4405_s3 + $0x170] sm:$0xff]  }
  0xa7   :  { %3094 = vmatprep.subr.bf16.mxu0 %v3274_v13  ;;  %3116 = vmatprep.subr.bf16.mxu1 %v3275_v14  ;;  %v3307_v13 = vld [vmem:[%s4405_s3 + $0x1f0] sm:$0xff]  }
  0xa8   :  { %v3308_v14 = vld [vmem:[%s4405_s3 + $0x130] sm:$0xff]  }
  0xaa   :  { %3095 = vmatpush3.bf16.msra.mxu0 %v3276_v15  ;;  %3117 = vmatpush3.bf16.msra.mxu1 %v3277_v16  ;;  %v3309_v15 = vld [vmem:[%s4405_s3 + $0x1b0] sm:$0xff]   ;;  %v3310_v16 = vld [vmem:[%s4405_s3 + $0x168] sm:$0xff]  }
  0xab   :  { %3096 = vmatprep.subr.bf16.mxu0 %v3278_v17  ;;  %3118 = vmatprep.subr.bf16.mxu1 %v3279_v26  ;;  %v3311_v17 = vld [vmem:[%s4405_s3 + $0x1e8] sm:$0xff]  }
  0xac   :  { %v3312_v26 = vld [vmem:[%s4405_s3 + $0x128] sm:$0xff]  }
  0xae   :  { %3097 = vmatpush3.bf16.msra.mxu0 %v3280_v18  ;;  %3119 = vmatpush3.bf16.msra.mxu1 %v3281_v19  ;;  %v3313_v18 = vld [vmem:[%s4405_s3 + $0x1a8] sm:$0xff]   ;;  %v3314_v19 = vld [vmem:[%s4405_s3 + $0x160] sm:$0xff]  }
  0xaf   :  { %3098 = vmatprep.subr.bf16.mxu0 %v3282_v20  ;;  %3120 = vmatprep.subr.bf16.mxu1 %v3283_v21  ;;  %v3315_v20 = vld [vmem:[%s4405_s3 + $0x1e0] sm:$0xff]  }
  0xb0   :  { %v3316_v21 = vld [vmem:[%s4405_s3 + $0x120] sm:$0xff]  }
  0xb2   :  { %3099 = vmatpush3.bf16.msra.mxu0 %v3284_v22  ;;  %3121 = vmatpush3.bf16.msra.mxu1 %v3285_v23  ;;  %v3317_v22 = vld [vmem:[%s4405_s3 + $0x1a0] sm:$0xff]   ;;  %v3318_v23 = vld [vmem:[%s4405_s3 + $0x158] sm:$0xff]  }
  0xb3   :  { %3100 = vmatprep.subr.bf16.mxu0 %v3286_v41  ;;  %3122 = vmatprep.subr.bf16.mxu1 %v3287_v24  ;;  %v3319_v41 = vld [vmem:[%s4405_s3 + $0x1d8] sm:$0xff]  }
  0xb4   :  { %v3320_v24 = vld [vmem:[%s4405_s3 + $0x118] sm:$0xff]  }
  0xb6   :  { %3101 = vmatpush3.bf16.msra.mxu0 %v3288_v25  ;;  %3123 = vmatpush3.bf16.msra.mxu1 %v3289_v27  ;;  %v3321_v25 = vld [vmem:[%s4405_s3 + $0x198] sm:$0xff]   ;;  %v3322_v27 = vld [vmem:[%s4405_s3 + $0x150] sm:$0xff]  }
  0xb7   :  { %3102 = vmatprep.subr.bf16.mxu0 %v3290_v28  ;;  %3124 = vmatprep.subr.bf16.mxu1 %v3291_v29  ;;  %v3323_v28 = vld [vmem:[%s4405_s3 + $0x1d0] sm:$0xff]  }
  0xb8   :  { %v3324_v29 = vld [vmem:[%s4405_s3 + $0x110] sm:$0xff]  }
  0xba   :  { %3103 = vmatpush3.bf16.msra.mxu0 %v3292_v30  ;;  %3125 = vmatpush3.bf16.msra.mxu1 %v3293_v31  ;;  %v3325_v30 = vld [vmem:[%s4405_s3 + $0x190] sm:$0xff]   ;;  %v3326_v31 = vld [vmem:[%s4405_s3 + $0x148] sm:$0xff]  }
  0xbb   :  { %3104 = vmatprep.subr.bf16.mxu0 %v3294_v32  ;;  %3126 = vmatprep.subr.bf16.mxu1 %v3295_v33  ;;  %v3327_v32 = vld [vmem:[%s4405_s3 + $0x1c8] sm:$0xff]  }
  0xbc   :  { %v3328_v33 = vld [vmem:[%s4405_s3 + $0x108] sm:$0xff]  }
  0xbe   :  { %3105 = vmatpush3.bf16.msra.mxu0 %v3296_v34  ;;  %3127 = vmatpush3.bf16.msra.mxu1 %v3297_v35  ;;  %v3329_v34 = vld [vmem:[%s4405_s3 + $0x188] sm:$0xff]   ;;  %v3330_v35 = vld [vmem:[%s4405_s3 + $0x140] sm:$0xff]  }
  0xbf   :  { %3106 = vmatprep.subr.bf16.mxu0 %v3298_v36  ;;  %3128 = vmatprep.subr.bf16.mxu1 %v3299_v37  ;;  %v204_v36 = vsub.s32 4, %v4047_v44  ;;  %v3331_v37 = vld [vmem:[%s4405_s3 + $0x1c0] sm:$0xff]  }
  0xc2   :  { %3107 = vmatpush3.bf16.msra.mxu0 %v3300_v38  ;;  %3129 = vmatpush3.bf16.msra.mxu1 %v3301_v39  ;;  %v212_v38 = vsub.s32 6, %v4047_v44  ;;  %v208_v39 = vsub.s32 5, %v4047_v44 }
  0xc3   :  { %3136 = vmatprep.subr.bf16.mxu0 %v3302_v40  ;;  %3158 = vmatprep.subr.bf16.mxu1 %v3303_v42  ;;  %v3332_v40 = vld [vmem:[%s4405_s3 + $0x100] sm:$0xff]   ;;  %v216_v42 = vsub.s32 7, %v4047_v44 }
  0xed   :  { %v1110_v53 = vpop.f32.mrf.mxu0  ;;  %v1151_v56 = vpop.f32.mrf.mxu1 }
  0xee   :  { %v1111_v55 = vadd.f32 %v1110_v53, %v189_v50  ;;  %v1152_v57 = vadd.f32 %v1151_v56, %v197_v51  ;;  %v3334_v50 = vld [vmem:[%s4405_s3 + $0x278] sm:$0xff]   ;;  %v205_v51 = vrot.slane %v4053_v46, %v204_v36  ;;  %v213_v53 = vrot.slane %v4053_v46, %v212_v38 }
  0xef   :  { %v1112_v58 = vpop.f32.mrf.mxu0  ;;  %v1153_v60 = vpop.f32.mrf.mxu1  ;;  %v217_v56 = vrot.slane %v4053_v46, %v216_v42 }
  0xf0   :  { %v1113_v59 = vadd.f32 %v1112_v58, %v193_v52  ;;  %v1404_v61 = vmax.f32 %v1111_v55, 0.0  ;;  %v1406_v62 = vmax.f32 %v1152_v57, 0.0  ;;  %v1154_v63 = vadd.f32 %v1153_v60, %v201_v54  ;;  %v3335_v52 = vld [vmem:[%s4405_s3 + $0x2f8] sm:$0xff]  }
  0xf1   :  { %v1114_v0 = vpop.f32.mrf.mxu0  ;;  %v1155_v2 = vpop.f32.mrf.mxu1  ;;  %v209_v54 = vrot.slane %v4053_v46, %v208_v39 }
  0xf2   :  { %v1405_v1 = vmax.f32 %v1113_v59, 0.0  ;;  %v1407_v3 = vmax.f32 %v1154_v63, 0.0  ;;  %v1422_v5 = vpack.c.bf16 %v1406_v62, %v1406_v62  ;;  %v1420_v9 = vpack.c.bf16 %v1404_v61, %v1404_v61 }
  0xf3   :  { %v1115_v4 = vpop.f32.mrf.mxu0  ;;  %v1156_v7 = vpop.f32.mrf.mxu1 }
  0xf4   :  { %v1421_v6 = vpack.c.bf16 %v1405_v1, %v1405_v1  ;;  %v1423_v10 = vpack.c.bf16 %v1407_v3, %v1407_v3 }
  0xf6   :  { %2499 = vmatprep.mubr.bf16.mxu0 %v1421_v6  ;;  %2539 = vmatprep.mubr.bf16.mxu1 %v1423_v10 }
  0xf7   :  { %2500 = vmatmul.mubr.bf16.vlgmr.msra.gmra.mxu0 %v1420_v9  ;;  %2540 = vmatmul.mubr.bf16.vlgmr.msra.gmra.mxu1 %v1422_v5  ;;  %v3336_v9 = vld [vmem:[%s4405_s3 + $0x238] sm:$0xff]  }
  0xf8   :  { %3137 = vmatpush3.bf16.msra.mxu0 %v3304_v8  ;;  %3159 = vmatpush3.bf16.msra.mxu1 %v3305_v11 }
  0xf9   :  { %3138 = vmatprep.subr.bf16.mxu0 %v3306_v12  ;;  %3160 = vmatprep.subr.bf16.mxu1 %v3307_v13  ;;  %v3337_v12 = vld [vmem:[%s4405_s3 + $0x2b8] sm:$0xff]   ;;  %v3338_v13 = vld [vmem:[%s4405_s3 + $0x270] sm:$0xff]  }
  0xfc   :  { %3139 = vmatpush3.bf16.msra.mxu0 %v3308_v14  ;;  %3161 = vmatpush3.bf16.msra.mxu1 %v3309_v15  ;;  %v3339_v14 = vld [vmem:[%s4405_s3 + $0x2f0] sm:$0xff]  }
  0xfd   :  { %3140 = vmatprep.subr.bf16.mxu0 %v3310_v16  ;;  %3162 = vmatprep.subr.bf16.mxu1 %v3311_v17  ;;  %v3340_v15 = vld [vmem:[%s4405_s3 + $0x230] sm:$0xff]   ;;  %v3342_v17 = vld [vmem:[%s4405_s3 + $0x268] sm:$0xff]  }
  0xfe   :  { %v3341_v16 = vld [vmem:[%s4405_s3 + $0x2b0] sm:$0xff]  }
 0x100   :  { %3141 = vmatpush3.bf16.msra.mxu0 %v3312_v26  ;;  %3163 = vmatpush3.bf16.msra.mxu1 %v3313_v18  ;;  %v3343_v26 = vld [vmem:[%s4405_s3 + $0x2e8] sm:$0xff]  }
 0x101   :  { %3142 = vmatprep.subr.bf16.mxu0 %v3314_v19  ;;  %3164 = vmatprep.subr.bf16.mxu1 %v3315_v20  ;;  %v3344_v18 = vld [vmem:[%s4405_s3 + $0x228] sm:$0xff]   ;;  %v3346_v20 = vld [vmem:[%s4405_s3 + $0x260] sm:$0xff]  }
 0x102   :  { %v3345_v19 = vld [vmem:[%s4405_s3 + $0x2a8] sm:$0xff]  }
 0x104   :  { %3143 = vmatpush3.bf16.msra.mxu0 %v3316_v21  ;;  %3165 = vmatpush3.bf16.msra.mxu1 %v3317_v22  ;;  %v3347_v21 = vld [vmem:[%s4405_s3 + $0x2e0] sm:$0xff]  }
 0x105   :  { %3144 = vmatprep.subr.bf16.mxu0 %v3318_v23  ;;  %3166 = vmatprep.subr.bf16.mxu1 %v3319_v41  ;;  %v3348_v22 = vld [vmem:[%s4405_s3 + $0x220] sm:$0xff]   ;;  %v3350_v41 = vld [vmem:[%s4405_s3 + $0x258] sm:$0xff]  }
 0x106   :  { %v3349_v23 = vld [vmem:[%s4405_s3 + $0x2a0] sm:$0xff]  }
 0x108   :  { %3145 = vmatpush3.bf16.msra.mxu0 %v3320_v24  ;;  %3167 = vmatpush3.bf16.msra.mxu1 %v3321_v25  ;;  %v3351_v24 = vld [vmem:[%s4405_s3 + $0x2d8] sm:$0xff]  }
 0x109   :  { %3146 = vmatprep.subr.bf16.mxu0 %v3322_v27  ;;  %3168 = vmatprep.subr.bf16.mxu1 %v3323_v28  ;;  %v3352_v25 = vld [vmem:[%s4405_s3 + $0x218] sm:$0xff]   ;;  %v3354_v28 = vld [vmem:[%s4405_s3 + $0x250] sm:$0xff]  }
 0x10a   :  { %v3353_v27 = vld [vmem:[%s4405_s3 + $0x298] sm:$0xff]  }
 0x10c   :  { %3147 = vmatpush3.bf16.msra.mxu0 %v3324_v29  ;;  %3169 = vmatpush3.bf16.msra.mxu1 %v3325_v30  ;;  %v3355_v29 = vld [vmem:[%s4405_s3 + $0x2d0] sm:$0xff]  }
 0x10d   :  { %3148 = vmatprep.subr.bf16.mxu0 %v3326_v31  ;;  %3170 = vmatprep.subr.bf16.mxu1 %v3327_v32  ;;  %v3356_v30 = vld [vmem:[%s4405_s3 + $0x210] sm:$0xff]   ;;  %v3358_v32 = vld [vmem:[%s4405_s3 + $0x248] sm:$0xff]  }
 0x10e   :  { %v3357_v31 = vld [vmem:[%s4405_s3 + $0x290] sm:$0xff]  }
 0x110   :  { %3149 = vmatpush3.bf16.msra.mxu0 %v3328_v33  ;;  %3171 = vmatpush3.bf16.msra.mxu1 %v3329_v34  ;;  %v3359_v33 = vld [vmem:[%s4405_s3 + $0x2c8] sm:$0xff]  }
 0x111   :  { %3150 = vmatprep.subr.bf16.mxu0 %v3330_v35  ;;  %3172 = vmatprep.subr.bf16.mxu1 %v3331_v37  ;;  %v3360_v34 = vld [vmem:[%s4405_s3 + $0x208] sm:$0xff]   ;;  %v3362_v37 = vld [vmem:[%s4405_s3 + $0x240] sm:$0xff]  }
 0x112   :  { %v3361_v35 = vld [vmem:[%s4405_s3 + $0x288] sm:$0xff]  }
 0x114   :  { %3151 = vmatpush3.bf16.msra.mxu0 %v3332_v40  ;;  %3173 = vmatpush3.bf16.msra.mxu1 %v3333_v43  ;;  %v3363_v40 = vld [vmem:[%s4405_s3 + $0x2c0] sm:$0xff]   ;;  %v4269_v43 = vld [vmem:[%s4406_s2 + $0x8] sm:$0xff] }
 0x115   :  { %v1192_v55 = vpop.f32.mrf.mxu0  ;;  %3180 = vmatprep.subr.bf16.mxu0 %v3334_v50  ;;  %v1233_v58 = vpop.f32.mrf.mxu1  ;;  %3202 = vmatprep.subr.bf16.mxu1 %v3335_v52  ;;  %v3364_v50 = vld [vmem:[%s4405_s3 + $0x200] sm:$0xff]   ;;  %v3366_v52 = vld [vmem:[%s4405_s3 + $0x378] sm:$0xff]  }
 0x116   :  { %v1193_v57 = vadd.f32 %v1192_v55, %v205_v51  ;;  %v1234_v59 = vadd.f32 %v1233_v58, %v213_v53  ;;  %v3365_v51 = vld [vmem:[%s4405_s3 + $0x280] sm:$0xff]   ;;  %v221_v53 = vrot.slane %v4269_v43, %v188_v45  ;;  %v229_v55 = vrot.slane %v4269_v43, %v196_v47 }
 0x117   :  { %v1194_v60 = vpop.f32.mrf.mxu0  ;;  %v1235_v62 = vpop.f32.mrf.mxu1  ;;  %v233_v58 = vrot.slane %v4269_v43, %v200_v49 }
 0x118   :  { %v1195_v61 = vadd.f32 %v1194_v60, %v209_v54  ;;  %v1408_v63 = vmax.f32 %v1193_v57, 0.0  ;;  %v1410_v0 = vmax.f32 %v1234_v59, 0.0  ;;  %v1236_v1 = vadd.f32 %v1235_v62, %v217_v56  ;;  %v3367_v54 = vld [vmem:[%s4405_s3 + $0x3f8] sm:$0xff]  }
 0x119   :  { %v1196_v2 = vpop.f32.mrf.mxu0  ;;  %v1237_v4 = vpop.f32.mrf.mxu1  ;;  %v225_v56 = vrot.slane %v4269_v43, %v192_v48 }
 0x11a   :  { %v1409_v3 = vmax.f32 %v1195_v61, 0.0  ;;  %v1411_v5 = vmax.f32 %v1236_v1, 0.0  ;;  %v1426_v7 = vpack.c.bf16 %v1410_v0, %v1410_v0  ;;  %v1424_v10 = vpack.c.bf16 %v1408_v63, %v1408_v63 }
 0x11b   :  { %v1197_v6 = vpop.f32.mrf.mxu0  ;;  %v1238_v46 = vpop.f32.mrf.mxu1 }
 0x11c   :  { %v1425_v8 = vpack.c.bf16 %v1409_v3, %v1409_v3  ;;  %v1427_v11 = vpack.c.bf16 %v1411_v5, %v1411_v5 }
 0x11e   :  { %2579 = vmatprep.mubr.bf16.mxu0 %v1425_v8  ;;  %2619 = vmatprep.mubr.bf16.mxu1 %v1427_v11  ;;  %v3368_v8 = vld [vmem:[%s4405_s3 + $0x338] sm:$0xff]   ;;  %v3370_v11 = vld [vmem:[%s4405_s3 + $0x370] sm:$0xff]  }
 0x11f   :  { %2580 = vmatmul.mubr.bf16.vlgmr.msra.gmra.mxu0 %v1424_v10  ;;  %2620 = vmatmul.mubr.bf16.vlgmr.msra.gmra.mxu1 %v1426_v7  ;;  %v3369_v10 = vld [vmem:[%s4405_s3 + $0x3b8] sm:$0xff]  }
 0x120   :  { %3181 = vmatpush3.bf16.msra.mxu0 %v3336_v9  ;;  %3203 = vmatpush3.bf16.msra.mxu1 %v3337_v12  ;;  %v3371_v12 = vld [vmem:[%s4405_s3 + $0x3f0] sm:$0xff]  }
 0x121   :  { %3182 = vmatprep.subr.bf16.mxu0 %v3338_v13  ;;  %3204 = vmatprep.subr.bf16.mxu1 %v3339_v14  ;;  %v3372_v13 = vld [vmem:[%s4405_s3 + $0x330] sm:$0xff]  }
 0x122   :  { %v3373_v14 = vld [vmem:[%s4405_s3 + $0x3b0] sm:$0xff]  }
 0x124   :  { %3183 = vmatpush3.bf16.msra.mxu0 %v3340_v15  ;;  %3205 = vmatpush3.bf16.msra.mxu1 %v3341_v16  ;;  %v3374_v15 = vld [vmem:[%s4405_s3 + $0x368] sm:$0xff]  }
 0x125   :  { %3184 = vmatprep.subr.bf16.mxu0 %v3342_v17  ;;  %3206 = vmatprep.subr.bf16.mxu1 %v3343_v26  ;;  %v3375_v16 = vld [vmem:[%s4405_s3 + $0x3e8] sm:$0xff]  }
 0x126   :  { %v3376_v17 = vld [vmem:[%s4405_s3 + $0x328] sm:$0xff]  }
 0x127   :  { %v3377_v26 = vld [vmem:[%s4405_s3 + $0x3a8] sm:$0xff]  }
 0x128   :  { %3185 = vmatpush3.bf16.msra.mxu0 %v3344_v18  ;;  %3207 = vmatpush3.bf16.msra.mxu1 %v3345_v19  ;;  %v3378_v18 = vld [vmem:[%s4405_s3 + $0x360] sm:$0xff]  }
 0x129   :  { %3186 = vmatprep.subr.bf16.mxu0 %v3346_v20  ;;  %3208 = vmatprep.subr.bf16.mxu1 %v3347_v21  ;;  %v3379_v19 = vld [vmem:[%s4405_s3 + $0x3e0] sm:$0xff]  }
 0x12a   :  { %v3380_v20 = vld [vmem:[%s4405_s3 + $0x320] sm:$0xff]  }
 0x12b   :  { %v3381_v21 = vld [vmem:[%s4405_s3 + $0x3a0] sm:$0xff]  }
 0x12c   :  { %3187 = vmatpush3.bf16.msra.mxu0 %v3348_v22  ;;  %3209 = vmatpush3.bf16.msra.mxu1 %v3349_v23  ;;  %v3382_v22 = vld [vmem:[%s4405_s3 + $0x358] sm:$0xff]  }
 0x12d   :  { %3188 = vmatprep.subr.bf16.mxu0 %v3350_v41  ;;  %3210 = vmatprep.subr.bf16.mxu1 %v3351_v24  ;;  %v3383_v23 = vld [vmem:[%s4405_s3 + $0x3d8] sm:$0xff]  }
 0x12e   :  { %v3384_v41 = vld [vmem:[%s4405_s3 + $0x318] sm:$0xff]  }
 0x12f   :  { %v3385_v24 = vld [vmem:[%s4405_s3 + $0x398] sm:$0xff]  }
 0x130   :  { %3189 = vmatpush3.bf16.msra.mxu0 %v3352_v25  ;;  %3211 = vmatpush3.bf16.msra.mxu1 %v3353_v27  ;;  %v3386_v25 = vld [vmem:[%s4405_s3 + $0x350] sm:$0xff]  }
 0x131   :  { %3190 = vmatprep.subr.bf16.mxu0 %v3354_v28  ;;  %3212 = vmatprep.subr.bf16.mxu1 %v3355_v29  ;;  %v3387_v27 = vld [vmem:[%s4405_s3 + $0x3d0] sm:$0xff]  }
 0x132   :  { %v3388_v28 = vld [vmem:[%s4405_s3 + $0x310] sm:$0xff]  }
 0x133   :  { %v3389_v29 = vld [vmem:[%s4405_s3 + $0x390] sm:$0xff]  }
 0x134   :  { %3191 = vmatpush3.bf16.msra.mxu0 %v3356_v30  ;;  %3213 = vmatpush3.bf16.msra.mxu1 %v3357_v31  ;;  %v3390_v30 = vld [vmem:[%s4405_s3 + $0x348] sm:$0xff]  }
 0x135   :  { %3192 = vmatprep.subr.bf16.mxu0 %v3358_v32  ;;  %3214 = vmatprep.subr.bf16.mxu1 %v3359_v33  ;;  %v3391_v31 = vld [vmem:[%s4405_s3 + $0x3c8] sm:$0xff]  }
 0x136   :  { %v3392_v32 = vld [vmem:[%s4405_s3 + $0x308] sm:$0xff]  }
 0x137   :  { %v3393_v33 = vld [vmem:[%s4405_s3 + $0x388] sm:$0xff]  }
 0x138   :  { %3193 = vmatpush3.bf16.msra.mxu0 %v3360_v34  ;;  %3215 = vmatpush3.bf16.msra.mxu1 %v3361_v35  ;;  %v3394_v34 = vld [vmem:[%s4405_s3 + $0x340] sm:$0xff]  }
 0x139   :  { %3194 = vmatprep.subr.bf16.mxu0 %v3362_v37  ;;  %3216 = vmatprep.subr.bf16.mxu1 %v3363_v40  ;;  %v3395_v35 = vld [vmem:[%s4405_s3 + $0x3c0] sm:$0xff]  }
 0x13a   :  { %v3396_v37 = vld [vmem:[%s4405_s3 + $0x300] sm:$0xff]  }
 0x13b   :  { %v3397_v40 = vld [vmem:[%s4405_s3 + $0x380] sm:$0xff]  }
 0x13c   :  { %3195 = vmatpush3.bf16.msra.mxu0 %v3364_v50  ;;  %3217 = vmatpush3.bf16.msra.mxu1 %v3365_v51  ;;  %v237_v50 = vrot.slane %v4269_v43, %v204_v36  ;;  %v245_v51 = vrot.slane %v4269_v43, %v212_v38 }
 0x13d   :  { %v1274_v57 = vpop.f32.mrf.mxu0  ;;  %3224 = vmatprep.subr.bf16.mxu0 %v3366_v52  ;;  %v1315_v59 = vpop.f32.mrf.mxu1  ;;  %3246 = vmatprep.subr.bf16.mxu1 %v3367_v54  ;;  %v241_v52 = vrot.slane %v4269_v43, %v208_v39  ;;  %v249_v54 = vrot.slane %v4269_v43, %v216_v42 }
 0x13e   :  { %v1275_v45 = vadd.f32 %v1274_v57, %v221_v53  ;;  %v1316_v60 = vadd.f32 %v1315_v59, %v229_v55 }
 0x13f   :  { %v1276_v61 = vpop.f32.mrf.mxu0  ;;  %v1317_v63 = vpop.f32.mrf.mxu1 }
 0x140   :  { %v1277_v62 = vadd.f32 %v1276_v61, %v225_v56  ;;  %v1412_v47 = vmax.f32 %v1275_v45, 0.0  ;;  %v1414_v0 = vmax.f32 %v1316_v60, 0.0  ;;  %v1318_v1 = vadd.f32 %v1317_v63, %v233_v58 }
 0x141   :  { %v1278_v2 = vpop.f32.mrf.mxu0  ;;  %v1319_v3 = vpop.f32.mrf.mxu1 }
 0x142   :  { %v1413_v48 = vmax.f32 %v1277_v62, 0.0  ;;  %v1415_v4 = vmax.f32 %v1318_v1, 0.0  ;;  %v1430_v6 = vpack.c.bf16 %v1414_v0, %v1414_v0  ;;  %v1428_v46 = vpack.c.bf16 %v1412_v47, %v1412_v47  ;;  %v2963_v3 = vld [vmem:[%s4407_s4] ss:$0 sm:$0xff] }
 0x143   :  { %v1279_v5 = vpop.f32.mrf.mxu0  ;;  %v1320_v49 = vpop.f32.mrf.mxu1 }
 0x144   :  { %v1429_v7 = vpack.c.bf16 %v1413_v48, %v1413_v48  ;;  %v1431_v9 = vpack.c.bf16 %v1415_v4, %v1415_v4 }
 0x146   :  { %2659 = vmatprep.mubr.bf16.mxu0 %v1429_v7  ;;  %2699 = vmatprep.mubr.bf16.mxu1 %v1431_v9 }
 0x147   :  { %2660 = vmatmul.mubr.bf16.vlgmr.msra.gmra.mxu0 %v1428_v46  ;;  %2700 = vmatmul.mubr.bf16.vlgmr.msra.gmra.mxu1 %v1430_v6 }
 0x148   :  { %3225 = vmatpush3.bf16.msra.mxu0 %v3368_v8  ;;  %3247 = vmatpush3.bf16.msra.mxu1 %v3369_v10 }
 0x149   :  { %3226 = vmatprep.subr.bf16.mxu0 %v3370_v11  ;;  %3248 = vmatprep.subr.bf16.mxu1 %v3371_v12 }
 0x14c   :  { %3227 = vmatpush3.bf16.msra.mxu0 %v3372_v13  ;;  %3249 = vmatpush3.bf16.msra.mxu1 %v3373_v14 }
 0x14d   :  { %3228 = vmatprep.subr.bf16.mxu0 %v3374_v15  ;;  %3250 = vmatprep.subr.bf16.mxu1 %v3375_v16 }
 0x150   :  { %3229 = vmatpush3.bf16.msra.mxu0 %v3376_v17  ;;  %3251 = vmatpush3.bf16.msra.mxu1 %v3377_v26 }
 0x151   :  { %3230 = vmatprep.subr.bf16.mxu0 %v3378_v18  ;;  %3252 = vmatprep.subr.bf16.mxu1 %v3379_v19 }
 0x154   :  { %3231 = vmatpush3.bf16.msra.mxu0 %v3380_v20  ;;  %3253 = vmatpush3.bf16.msra.mxu1 %v3381_v21 }
 0x155   :  { %3232 = vmatprep.subr.bf16.mxu0 %v3382_v22  ;;  %3254 = vmatprep.subr.bf16.mxu1 %v3383_v23 }
 0x158   :  { %3233 = vmatpush3.bf16.msra.mxu0 %v3384_v41  ;;  %3255 = vmatpush3.bf16.msra.mxu1 %v3385_v24 }
 0x159   :  { %3234 = vmatprep.subr.bf16.mxu0 %v3386_v25  ;;  %3256 = vmatprep.subr.bf16.mxu1 %v3387_v27 }
 0x15c   :  { %3235 = vmatpush3.bf16.msra.mxu0 %v3388_v28  ;;  %3257 = vmatpush3.bf16.msra.mxu1 %v3389_v29 }
 0x15d   :  { %3236 = vmatprep.subr.bf16.mxu0 %v3390_v30  ;;  %3258 = vmatprep.subr.bf16.mxu1 %v3391_v31 }
 0x160   :  { %3237 = vmatpush3.bf16.msra.mxu0 %v3392_v32  ;;  %3259 = vmatpush3.bf16.msra.mxu1 %v3393_v33 }
 0x161   :  { %3238 = vmatprep.subr.bf16.mxu0 %v3394_v34  ;;  %3260 = vmatprep.subr.bf16.mxu1 %v3395_v35 }
 0x164   :  { %3239 = vmatpush3.bf16.msra.mxu0 %v3396_v37  ;;  %3261 = vmatpush3.bf16.msra.mxu1 %v3397_v40 }
 0x165   :  { %v1356_v53 = vpop.f32.mrf.mxu0  ;;  %v1397_v56 = vpop.f32.mrf.mxu1 }
 0x166   :  { %v1357_v55 = vadd.f32 %v1356_v53, %v237_v50  ;;  %v1398_v57 = vadd.f32 %v1397_v56, %v245_v51 }
 0x167   :  { %v1358_v36 = vpop.f32.mrf.mxu0  ;;  %v1399_v45 = vpop.f32.mrf.mxu1 }
 0x168   :  { %v1359_v58 = vadd.f32 %v1358_v36, %v241_v52  ;;  %v1416_v59 = vmax.f32 %v1357_v55, 0.0  ;;  %v1418_v60 = vmax.f32 %v1398_v57, 0.0  ;;  %v1400_v38 = vadd.f32 %v1399_v45, %v249_v54 }
 0x169   :  { %v1360_v61 = vpop.f32.mrf.mxu0  ;;  %v1401_v63 = vpop.f32.mrf.mxu1 }
 0x16a   :  { %v1417_v62 = vmax.f32 %v1359_v58, 0.0  ;;  %v1419_v39 = vmax.f32 %v1400_v38, 0.0  ;;  %v1434_v0 = vpack.c.bf16 %v1418_v60, %v1418_v60  ;;  %v1432_v2 = vpack.c.bf16 %v1416_v59, %v1416_v59 }
 0x16b   :  { %v1361_v47 = vpop.f32.mrf.mxu0  ;;  %v1402_v44 = vpop.f32.mrf.mxu1 }
 0x16c   :  { %v1433_v1 = vpack.c.bf16 %v1417_v62, %v1417_v62  ;;  %v1435_v42 = vpack.c.bf16 %v1419_v39, %v1419_v39 }
 0x16e   :  { %2739 = vmatprep.mubr.bf16.mxu0 %v1433_v1  ;;  %2779 = vmatprep.mubr.bf16.mxu1 %v1435_v42 }
 0x16f   :  { %2740 = vmatmul.mubr.bf16.vlgmr.msra.gmra.mxu0 %v1432_v2  ;;  %2780 = vmatmul.mubr.bf16.vlgmr.msra.gmra.mxu1 %v1434_v0 }
 0x1b7   :  { %v3108_v43 = vpop.f32.mrf.mxu0  ;;  %v3130_v48 = vpop.f32.mrf.mxu1 }
 0x1b9   :  { %v3109_v4 = vpop.f32.mrf.mxu0  ;;  %v3131_v6 = vpop.f32.mrf.mxu1 }
 0x1ba   :  { %v3110_v5 = vadd.f32 %v3109_v4, %v3108_v43  ;;  %v3132_v7 = vadd.f32 %v3131_v6, %v3130_v48 }
 0x1bb   :  { %v3111_v49 = vpop.f32.mrf.mxu0  ;;  %v3133_v46 = vpop.f32.mrf.mxu1 }
 0x1bc   :  { %v2502_v8 = vadd.f32 %v3110_v5, %v2963_v3 }
 0x1bd   :  { %v3112_v9 = vpop.f32.mrf.mxu0  ;;  %v3134_v11 = vpop.f32.mrf.mxu1 }
 0x1be   :  { %v2542_v10 = vadd.f32 %v3132_v7, %v2502_v8 }
 0x1df   :  { %v3152_v12 = vpop.f32.mrf.mxu0  ;;  %v3174_v13 = vpop.f32.mrf.mxu1 }
 0x1e1   :  { %v3153_v14 = vpop.f32.mrf.mxu0  ;;  %v3175_v16 = vpop.f32.mrf.mxu1 }
 0x1e2   :  { %v3154_v15 = vadd.f32 %v3153_v14, %v3152_v12  ;;  %v3176_v17 = vadd.f32 %v3175_v16, %v3174_v13 }
 0x1e3   :  { %v3155_v26 = vpop.f32.mrf.mxu0  ;;  %v3177_v19 = vpop.f32.mrf.mxu1 }
 0x1e4   :  { %v2582_v18 = vadd.f32 %v3154_v15, %v2542_v10 }
 0x1e5   :  { %v3156_v20 = vpop.f32.mrf.mxu0  ;;  %v3178_v22 = vpop.f32.mrf.mxu1 }
 0x1e6   :  { %v2622_v21 = vadd.f32 %v3176_v17, %v2582_v18 }
 0x207   :  { %v3196_v23 = vpop.f32.mrf.mxu0  ;;  %v3218_v41 = vpop.f32.mrf.mxu1 }
 0x209   :  { %v3197_v24 = vpop.f32.mrf.mxu0  ;;  %v3219_v25 = vpop.f32.mrf.mxu1 }
 0x20a   :  { %v3198_v31 = vadd.f32 %v3197_v24, %v3196_v23  ;;  %v3220_v34 = vadd.f32 %v3219_v25, %v3218_v41 }
 0x20b   :  { %v3199_v27 = vpop.f32.mrf.mxu0  ;;  %v3221_v28 = vpop.f32.mrf.mxu1 }
 0x20c   :  { %v2662_v32 = vadd.f32 %v3198_v31, %v2622_v21 }
 0x20d   :  { %v3200_v29 = vpop.f32.mrf.mxu0  ;;  %v3222_v30 = vpop.f32.mrf.mxu1 }
 0x20e   :  { %v2702_v40 = vadd.f32 %v3220_v34, %v2662_v32 }
 0x22f   :  { %v3240_v33 = vpop.f32.mrf.mxu0  ;;  %v3262_v35 = vpop.f32.mrf.mxu1 }
 0x231   :  { %v3241_v37 = vpop.f32.mrf.mxu0  ;;  %v3263_v51 = vpop.f32.mrf.mxu1 }
 0x232   :  { %v3242_v50 = vadd.f32 %v3241_v37, %v3240_v33  ;;  %v3264_v54 = vadd.f32 %v3263_v51, %v3262_v35 }
 0x233   :  { %v3243_v52 = vpop.f32.mrf.mxu0  ;;  %v3265_v55 = vpop.f32.mrf.mxu1 }
 0x234   :  { %v2742_v53 = vadd.f32 %v3242_v50, %v2702_v40 }
 0x235   :  { %v3244_v56 = vpop.f32.mrf.mxu0  ;;  %v3266_v36 = vpop.f32.mrf.mxu1 }
 0x236   :  { %v2782_v57 = vadd.f32 %v3264_v54, %v2742_v53 }
 0x238   :  { %v2787_v58 = vpack.c.bf16 %v2782_v57, %v2782_v57 }
 0x23a   :  { %2788 = vst [vmem:[%s4408_s5] sm:$0xf] %v2787_v58 }

</bundles_post_ra>
